<compile_context>
chip_gen: v7x
topology: tpu7x:2x2x1
jax: 0.10.0
libtpu: 0.0.40
codegen_flags: <defaults>
</compile_context>

<pallas_src>
import numpy as np

import jax
import jax.numpy as jnp
from jax import lax
from jax.experimental import pallas as pl
from jax.experimental.pallas import tpu as pltpu


def _round_up(x: int, m: int) -> int:
    return ((x + m - 1) // m) * m


def _decoder_stats_kernel(x_ref, out_ref):
    # x_ref:   (tile_rows, D)          f32 block of embeddings (rows = embeddings)
    # out_ref: (chunks, 8, chunk)      f32 packed per-row statistics
    n_chunks, _, chunk = out_ref.shape
    d = x_ref.shape[1]
    inv_d = jnp.float32(1.0 / d)
    neg_inf = jnp.float32(-jnp.inf)

    # Constants hoisted out of the chunk loop (JAX does not CSE broadcasts).
    # MXU LHS: rows 0..d-1 = identity (-> transpose), rows d..d+7 = ones
    # (-> per-embedding sum).  One matmul does both.
    mi = lax.broadcasted_iota(jnp.int32, (d + 8, d), 0)
    ki = lax.broadcasted_iota(jnp.int32, (d + 8, d), 1)
    lhs = jnp.where((mi == ki) | (mi >= d), jnp.float32(1.0), jnp.float32(0.0))
    row = lax.broadcasted_iota(jnp.int32, (d, chunk), 0)   # dimension index per row
    sub = lax.broadcasted_iota(jnp.int32, (8, chunk), 0)   # output slot id

    def body(c, carry):
        off = pl.multiple_of(c * chunk, chunk)
        xc = x_ref[pl.ds(off, chunk), :]                    # (chunk, d)

        # MXU pass #1: xt = xc.T and s1 = column sums, contracting both minor
        # dims (the flash-attention q @ k.T form).  HIGHEST => exact for the
        # 0/1 LHS weights.
        xt_s = lax.dot_general(
            lhs, xc, (((1,), (1,)), ((), ())),
            preferred_element_type=jnp.float32,
            precision=lax.Precision.HIGHEST)                # (d + 8, chunk)
        xt = xt_s[0:d, :]                                   # (d, chunk) == xc.T
        s1 = xt_s[d:d + 1, :]                               # (1, chunk)

        mean = s1 * inv_d
        xmax = jnp.max(xt, axis=0, keepdims=True)
        xmin = jnp.min(xt, axis=0, keepdims=True)

        # Two-pass (centered) variance: robust when |mean| >> std.  MXU pass
        # #2 reduces the centered squares (standard (8,d) @ (d,chunk) form).
        ctr = xt - mean
        s2 = lax.dot_general(
            lhs[d:, :], ctr * ctr, (((1,), (0,)), ((), ())),
            preferred_element_type=jnp.float32,
            precision=lax.Precision.HIGHEST)[0:1, :]        # (1, chunk)
        std = jnp.sqrt(s2 * inv_d)

        # Top-3 indices of |x| via iterative argmax (ties -> highest index).
        # The first maximum reuses xmax/xmin: max|x| == max(xmax, -xmin).
        absx = jnp.abs(xt)
        m0 = jnp.maximum(xmax, -xmin)
        i0 = jnp.max(jnp.where(absx == m0, row, -1), axis=0, keepdims=True)
        cur = jnp.where(row == i0, neg_inf, absx)
        m1 = jnp.max(cur, axis=0, keepdims=True)
        i1 = jnp.max(jnp.where(cur == m1, row, -1), axis=0, keepdims=True)
        cur = jnp.where(row == i1, neg_inf, cur)
        m2 = jnp.max(cur, axis=0, keepdims=True)
        i2 = jnp.max(jnp.where(cur == m2, row, -1), axis=0, keepdims=True)

        # Pack the eight per-row scalars into one lane-dense (8, chunk) slab
        # (indices are < 2**24, so the f32 round-trip is exact).
        packed = jnp.where(sub == 0, mean,
                 jnp.where(sub == 1, std,
                 jnp.where(sub == 2, xmax,
                 jnp.where(sub == 3, xmin,
                 jnp.where(sub == 4, i2.astype(jnp.float32),   # 3rd-largest |x|
                 jnp.where(sub == 5, i1.astype(jnp.float32),   # 2nd-largest |x|
                 jnp.where(sub == 6, i0.astype(jnp.float32),   # largest |x|
                           jnp.float32(0.0))))))))             # pad row
        out_ref[c] = packed
        return carry

    # unroll=2 lets the scheduler overlap one chunk's MXU latency with the
    # previous chunk's VPU/XLU work.
    unroll = 2 if n_chunks > 1 else 1
    lax.fori_loop(0, n_chunks, body, 0, unroll=unroll)


def decoder_stats(embeds, *, tile_rows=None, chunk=256):
    """Per-row (mean, std, max, min) and top-3 |value| indices.

    Returns (stats, top_idx): stats is (N, 4) f32 [mean, std, max, min],
    top_idx is (N, 3) int32 in np.argsort(|v|, axis=1)[:, -3:] order.
    """
    if embeds.dtype != jnp.float32:
        embeds = embeds.astype(jnp.float32)
    n, d = embeds.shape

    # Rows handled per inner-loop iteration; intermediates are (d, chunk) f32
    # (8 vregs for d=32, chunk=256) and stay register-resident.
    chunk = max(128, _round_up(chunk, 128))

    # Rows per grid step: as large as comfortably fits the chip's VMEM
    # (v5e/v6e 128 MiB -> 32K rows, v7x 64 MiB -> 16K rows) so the ~0.35 us
    # per-grid-step overhead is amortized to <10%.
    if tile_rows is None:
        try:
            info = pltpu.get_tpu_info()
            vmem_bytes = int(getattr(info, "vmem_capacity_bytes", 64 * 1024 * 1024))
        except Exception:
            vmem_bytes = 64 * 1024 * 1024
        tile_rows = 32768 if vmem_bytes >= 128 * 1024 * 1024 else 16384

    # Tiny inputs: pad rows up to one chunk (a few KiB) so block dims never
    # exceed the array dims.  Larger inputs are NOT padded -- the trailing
    # partial block is handled by Pallas' masked DMA and the garbage columns
    # are sliced away below (no extra HBM pass over the embeddings).
    n_rows = n
    if n_rows < chunk:
        embeds = jnp.pad(embeds, ((0, chunk - n_rows), (0, 0)))
        n_rows = chunk

    tile_rows = _round_up(min(tile_rows, _round_up(n_rows, chunk)), chunk)
    grid = pl.cdiv(n_rows, tile_rows)
    # Balance the tiles so padding waste is < one chunk per tile.
    tile_rows = _round_up(pl.cdiv(_round_up(n_rows, chunk), grid), chunk)
    grid = pl.cdiv(n_rows, tile_rows)
    # v7x megacore: a single-tile grid leaves one TensorCore idle -> split
    # (harmless extra grid step on single-core v5e/v6e).
    if grid == 1 and tile_rows >= 2 * chunk:
        tile_rows = _round_up(pl.cdiv(tile_rows, 2), chunk)
        grid = pl.cdiv(n_rows, tile_rows)

    chunks_per_tile = tile_rows // chunk
    total_chunks = grid * chunks_per_tile

    # Double-buffered input + output blocks plus slack for Mosaic scratch.
    vmem_limit = 2 * tile_rows * d * 4 + 2 * tile_rows * 8 * 4 + (8 << 20)
    vmem_limit = min(vmem_limit, 96 << 20)

    packed = pl.pallas_call(
        _decoder_stats_kernel,
        out_shape=jax.ShapeDtypeStruct((total_chunks, 8, chunk), jnp.float32),
        grid=(grid,),
        in_specs=[pl.BlockSpec((tile_rows, d), lambda i: (i, 0))],
        out_specs=pl.BlockSpec((chunks_per_tile, 8, chunk), lambda i: (i, 0, 0)),
        compiler_params=pltpu.CompilerParams(
            dimension_semantics=("parallel",),
            vmem_limit_bytes=vmem_limit,
        ),
    )(embeds)

    # Tiny (8 f32 / row) re-layout of the packed result; negligible vs input.
    flat = jnp.transpose(packed, (0, 2, 1)).reshape(total_chunks * chunk, 8)[:n]
    stats = flat[:, 0:4]                          # mean, std, max, min
    top_idx = flat[:, 4:7].astype(jnp.int32)      # argsort(|v|)[-3:] order
    return stats, top_idx


def direct_tensor_decoder_forward(embeds, gcn_embedding_dim=32):
    """JAX/Pallas equivalent of DirectTensorDecoder.forward (returns list[str])."""
    del gcn_embedding_dim  # signature parity with the nn.Module
    stats_d, top_idx_d = decoder_stats(embeds)
    # Only the first 5 values per row are displayed; slice on device before the
    # host transfer instead of pulling back the whole (N, D) array.
    preview_d = embeds[:, :5].astype(jnp.float32)
    stats, top_idx, preview = jax.device_get((stats_d, top_idx_d, preview_d))
    stats = np.asarray(stats)
    top_idx = np.asarray(top_idx)
    preview = np.asarray(preview)

    descriptions = []
    for i in range(stats.shape[0]):
        mean_v, std_v, max_v, min_v = (float(s) for s in stats[i])
        desc = f"Embedding {i}: This vector has "
        if mean_v > 0.1:
            desc += "predominantly positive values, "
        elif mean_v < -0.1:
            desc += "predominantly negative values, "
        else:
            desc += "balanced positive/negative values, "
        if std_v > 0.5:
            desc += "high variance (spread out), "
        else:
            desc += "low variance (clustered), "
        desc += f"strongest signals in dimensions {top_idx[i].tolist()}, "
        desc += f"with peak value {max_v:.3f} and minimum {min_v:.3f}. "
        # TODO(synk): the f-string / list[str] text assembly has no Pallas
        # equivalent; it remains host-side glue over the kernel's statistics.
        desc += f"Raw pattern: {[round(float(x), 3) for x in preview[i]]}..."
        descriptions.append(desc)
    return descriptions


if __name__ == "__main__":
    # Shapes consistent with the module: a handful of embeddings, dim 32.
    N, D = 8, 32
    key = jax.random.PRNGKey(0)
    embeds = jax.random.normal(key, (N, D), dtype=jnp.float32)

    stats, top_idx = decoder_stats(embeds)
    jax.block_until_ready((stats, top_idx))

    # Numeric cross-check against the numpy reference used by the module.
    v = np.asarray(jax.device_get(embeds))
    ref_stats = np.stack(
        [v.mean(axis=1), v.std(axis=1), v.max(axis=1), v.min(axis=1)], axis=1
    ).astype(np.float32)
    ref_idx = np.argsort(np.abs(v), axis=1)[:, -3:]
    assert np.allclose(np.asarray(stats), ref_stats, rtol=1e-4, atol=1e-5), "stats mismatch"
    assert np.array_equal(np.asarray(top_idx), ref_idx), "top-3 index mismatch"

    # Exercise the multi-tile grid + unpadded ragged-tail path, with a mean
    # offset so the two-pass variance path is meaningfully tested.
    N2 = 300
    embeds2 = jax.random.normal(jax.random.PRNGKey(1), (N2, D), dtype=jnp.float32) * 2.0 + 0.75
    stats2, idx2 = decoder_stats(embeds2)
    jax.block_until_ready((stats2, idx2))
    v2 = np.asarray(jax.device_get(embeds2))
    ref_stats2 = np.stack(
        [v2.mean(axis=1), v2.std(axis=1), v2.max(axis=1), v2.min(axis=1)], axis=1
    ).astype(np.float32)
    assert np.allclose(np.asarray(stats2), ref_stats2, rtol=1e-4, atol=1e-4), "stats mismatch (N=300)"
    assert np.array_equal(np.asarray(idx2), np.argsort(np.abs(v2), axis=1)[:, -3:]), "index mismatch (N=300)"

    descriptions = direct_tensor_decoder_forward(embeds)
    assert len(descriptions) == N and all(isinstance(s, str) for s in descriptions)

    print("KERNEL_OK")
</pallas_src>

<mosaic_0001>
module attributes {stable_mosaic.version = 11 : i64} {
  func.func @_decoder_stats_kernel(%arg0: i32, %arg1: memref<256x32xf32, #tpu.memory_space<vmem>>, %arg2: memref<1x8x256xf32, #tpu.memory_space<vmem>>) attributes {dimension_semantics = [#tpu.dimension_semantics<parallel>], iteration_bounds = array<i64: 1>, scalar_prefetch = 0 : i64, scratch_operands = 0 : i64, tpu.core_type = #tpu.core_type<tc>, window_params = [{transform_indices = @transform_0, window_bounds = array<i64: 256, 32>}, {transform_indices = @transform_1, window_bounds = array<i64: 1, 8, 256>}]} {
    %0 = tpu.iota {dimensions = array<i32: 0>} : vector<40x32xi32>
    %1 = tpu.iota {dimensions = array<i32: 1>} : vector<40x32xi32>
    %2 = arith.cmpi eq, %0, %1 : vector<40x32xi32>
    %c32_i32 = arith.constant 32 : i32
    %3 = vector.broadcast %c32_i32 : i32 to vector<40x32xi32>
    %4 = arith.cmpi sge, %0, %3 : vector<40x32xi32>
    %5 = arith.ori %2, %4 : vector<40x32xi1>
    %cst = arith.constant 1.000000e+00 : f32
    %cst_0 = arith.constant 0.000000e+00 : f32
    %6 = vector.broadcast %cst : f32 to vector<40x32xf32>
    %7 = vector.broadcast %cst_0 : f32 to vector<40x32xf32>
    %8 = arith.select %5, %6, %7 : vector<40x32xi1>, vector<40x32xf32>
    %9 = tpu.iota {dimensions = array<i32: 0>} : vector<32x256xi32>
    %10 = tpu.iota {dimensions = array<i32: 0>} : vector<8x256xi32>
    %cst_1 = arith.constant 3.125000e-02 : f32
    %cst_2 = arith.constant 0xFF800000 : f32
    %c0_i32 = arith.constant 0 : i32
    %c256_i32 = arith.constant 256 : i32
    %11 = arith.muli %c0_i32, %c256_i32 : i32
    %12 = tpu.assume_multiple %11, 256 : i32
    %13 = arith.index_cast %12 : i32 to index
    %c0 = arith.constant 0 : index
    %14 = vector.load %arg1[%13, %c0] : memref<256x32xf32, #tpu.memory_space<vmem>>, vector<256x32xf32>
    %cst_3 = arith.constant dense<0.000000e+00> : vector<40x256xf32>
    %15 = tpu.matmul %8, %14, %cst_3 {dimension_numbers = #tpu.dot_dimension_numbers<[1], [1], [0], [0], [0, 0, 1, 0], [], []>, precision = #tpu.contract_precision<fp32>} : vector<40x32xf32>, vector<256x32xf32>, vector<40x256xf32> -> vector<40x256xf32>
    %16 = vector.extract_strided_slice %15 {offsets = [0, 0], sizes = [32, 256], strides = [1, 1]} : vector<40x256xf32> to vector<32x256xf32>
    %17 = vector.extract_strided_slice %15 {offsets = [32, 0], sizes = [1, 256], strides = [1, 1]} : vector<40x256xf32> to vector<1x256xf32>
    %18 = vector.broadcast %cst_1 : f32 to vector<1x256xf32>
    %19 = arith.mulf %17, %18 : vector<1x256xf32>
    %cst_4 = arith.constant dense<0xFF800000> : vector<256xf32>
    %20 = vector.multi_reduction <maximumf>, %16, %cst_4 [0] : vector<32x256xf32> to vector<256xf32>
    %21 = vector.shape_cast %20 : vector<256xf32> to vector<1x256xf32>
    %cst_5 = arith.constant dense<0x7F800000> : vector<256xf32>
    %22 = vector.multi_reduction <minimumf>, %16, %cst_5 [0] : vector<32x256xf32> to vector<256xf32>
    %23 = vector.shape_cast %22 : vector<256xf32> to vector<1x256xf32>
    %24 = vector.broadcast %19 : vector<1x256xf32> to vector<32x256xf32>
    %25 = arith.subf %16, %24 : vector<32x256xf32>
    %26 = vector.extract_strided_slice %8 {offsets = [32, 0], sizes = [8, 32], strides = [1, 1]} : vector<40x32xf32> to vector<8x32xf32>
    %27 = arith.mulf %25, %25 : vector<32x256xf32>
    %cst_6 = arith.constant dense<0.000000e+00> : vector<8x256xf32>
    %28 = tpu.matmul %26, %27, %cst_6 {dimension_numbers = #tpu.dot_dimension_numbers<[1], [0], [0], [1], [0, 0, 1, 1], [], []>, precision = #tpu.contract_precision<fp32>} : vector<8x32xf32>, vector<32x256xf32>, vector<8x256xf32> -> vector<8x256xf32>
    %29 = vector.extract_strided_slice %28 {offsets = [0, 0], sizes = [1, 256], strides = [1, 1]} : vector<8x256xf32> to vector<1x256xf32>
    %30 = vector.broadcast %cst_1 : f32 to vector<1x256xf32>
    %31 = arith.mulf %29, %30 : vector<1x256xf32>
    %32 = math.sqrt %31 : vector<1x256xf32>
    %33 = math.absf %16 : vector<32x256xf32>
    %cst_7 = arith.constant 0.000000e+00 : f32
    %34 = vector.broadcast %cst_7 : f32 to vector<1x256xf32>
    %35 = arith.subf %34, %23 : vector<1x256xf32>
    %36 = arith.maximumf %21, %35 : vector<1x256xf32>
    %37 = vector.broadcast %36 : vector<1x256xf32> to vector<32x256xf32>
    %38 = arith.cmpf oeq, %33, %37 : vector<32x256xf32>
    %c-1_i32 = arith.constant -1 : i32
    %39 = vector.broadcast %c-1_i32 : i32 to vector<32x256xi32>
    %40 = arith.select %38, %9, %39 : vector<32x256xi1>, vector<32x256xi32>
    %cst_8 = arith.constant dense<-2147483648> : vector<256xi32>
    %41 = vector.multi_reduction <maxsi>, %40, %cst_8 [0] : vector<32x256xi32> to vector<256xi32>
    %42 = vector.shape_cast %41 : vector<256xi32> to vector<1x256xi32>
    %43 = vector.broadcast %42 : vector<1x256xi32> to vector<32x256xi32>
    %44 = arith.cmpi eq, %9, %43 : vector<32x256xi32>
    %45 = vector.broadcast %cst_2 : f32 to vector<32x256xf32>
    %46 = arith.select %44, %45, %33 : vector<32x256xi1>, vector<32x256xf32>
    %cst_9 = arith.constant dense<0xFF800000> : vector<256xf32>
    %47 = vector.multi_reduction <maximumf>, %46, %cst_9 [0] : vector<32x256xf32> to vector<256xf32>
    %48 = vector.shape_cast %47 : vector<256xf32> to vector<1x256xf32>
    %49 = vector.broadcast %48 : vector<1x256xf32> to vector<32x256xf32>
    %50 = arith.cmpf oeq, %46, %49 : vector<32x256xf32>
    %c-1_i32_10 = arith.constant -1 : i32
    %51 = vector.broadcast %c-1_i32_10 : i32 to vector<32x256xi32>
    %52 = arith.select %50, %9, %51 : vector<32x256xi1>, vector<32x256xi32>
    %cst_11 = arith.constant dense<-2147483648> : vector<256xi32>
    %53 = vector.multi_reduction <maxsi>, %52, %cst_11 [0] : vector<32x256xi32> to vector<256xi32>
    %54 = vector.shape_cast %53 : vector<256xi32> to vector<1x256xi32>
    %55 = vector.broadcast %54 : vector<1x256xi32> to vector<32x256xi32>
    %56 = arith.cmpi eq, %9, %55 : vector<32x256xi32>
    %57 = vector.broadcast %cst_2 : f32 to vector<32x256xf32>
    %58 = arith.select %56, %57, %46 : vector<32x256xi1>, vector<32x256xf32>
    %cst_12 = arith.constant dense<0xFF800000> : vector<256xf32>
    %59 = vector.multi_reduction <maximumf>, %58, %cst_12 [0] : vector<32x256xf32> to vector<256xf32>
    %60 = vector.shape_cast %59 : vector<256xf32> to vector<1x256xf32>
    %61 = vector.broadcast %60 : vector<1x256xf32> to vector<32x256xf32>
    %62 = arith.cmpf oeq, %58, %61 : vector<32x256xf32>
    %c-1_i32_13 = arith.constant -1 : i32
    %63 = vector.broadcast %c-1_i32_13 : i32 to vector<32x256xi32>
    %64 = arith.select %62, %9, %63 : vector<32x256xi1>, vector<32x256xi32>
    %cst_14 = arith.constant dense<-2147483648> : vector<256xi32>
    %65 = vector.multi_reduction <maxsi>, %64, %cst_14 [0] : vector<32x256xi32> to vector<256xi32>
    %66 = vector.shape_cast %65 : vector<256xi32> to vector<1x256xi32>
    %c0_i32_15 = arith.constant 0 : i32
    %67 = vector.broadcast %c0_i32_15 : i32 to vector<8x256xi32>
    %68 = arith.cmpi eq, %10, %67 : vector<8x256xi32>
    %c1_i32 = arith.constant 1 : i32
    %69 = vector.broadcast %c1_i32 : i32 to vector<8x256xi32>
    %70 = arith.cmpi eq, %10, %69 : vector<8x256xi32>
    %c2_i32 = arith.constant 2 : i32
    %71 = vector.broadcast %c2_i32 : i32 to vector<8x256xi32>
    %72 = arith.cmpi eq, %10, %71 : vector<8x256xi32>
    %c3_i32 = arith.constant 3 : i32
    %73 = vector.broadcast %c3_i32 : i32 to vector<8x256xi32>
    %74 = arith.cmpi eq, %10, %73 : vector<8x256xi32>
    %c4_i32 = arith.constant 4 : i32
    %75 = vector.broadcast %c4_i32 : i32 to vector<8x256xi32>
    %76 = arith.cmpi eq, %10, %75 : vector<8x256xi32>
    %77 = arith.sitofp %66 : vector<1x256xi32> to vector<1x256xf32>
    %c5_i32 = arith.constant 5 : i32
    %78 = vector.broadcast %c5_i32 : i32 to vector<8x256xi32>
    %79 = arith.cmpi eq, %10, %78 : vector<8x256xi32>
    %80 = arith.sitofp %54 : vector<1x256xi32> to vector<1x256xf32>
    %c6_i32 = arith.constant 6 : i32
    %81 = vector.broadcast %c6_i32 : i32 to vector<8x256xi32>
    %82 = arith.cmpi eq, %10, %81 : vector<8x256xi32>
    %83 = arith.sitofp %42 : vector<1x256xi32> to vector<1x256xf32>
    %cst_16 = arith.constant 0.000000e+00 : f32
    %84 = vector.shape_cast %83 : vector<1x256xf32> to vector<1x256xf32>
    %85 = vector.broadcast %84 : vector<1x256xf32> to vector<8x256xf32>
    %86 = vector.broadcast %cst_16 : f32 to vector<8x256xf32>
    %87 = arith.select %82, %85, %86 : vector<8x256xi1>, vector<8x256xf32>
    %88 = vector.shape_cast %80 : vector<1x256xf32> to vector<1x256xf32>
    %89 = vector.broadcast %88 : vector<1x256xf32> to vector<8x256xf32>
    %90 = arith.select %79, %89, %87 : vector<8x256xi1>, vector<8x256xf32>
    %91 = vector.shape_cast %77 : vector<1x256xf32> to vector<1x256xf32>
    %92 = vector.broadcast %91 : vector<1x256xf32> to vector<8x256xf32>
    %93 = arith.select %76, %92, %90 : vector<8x256xi1>, vector<8x256xf32>
    %94 = vector.shape_cast %23 : vector<1x256xf32> to vector<1x256xf32>
    %95 = vector.broadcast %94 : vector<1x256xf32> to vector<8x256xf32>
    %96 = arith.select %74, %95, %93 : vector<8x256xi1>, vector<8x256xf32>
    %97 = vector.shape_cast %21 : vector<1x256xf32> to vector<1x256xf32>
    %98 = vector.broadcast %97 : vector<1x256xf32> to vector<8x256xf32>
    %99 = arith.select %72, %98, %96 : vector<8x256xi1>, vector<8x256xf32>
    %100 = vector.shape_cast %32 : vector<1x256xf32> to vector<1x256xf32>
    %101 = vector.broadcast %100 : vector<1x256xf32> to vector<8x256xf32>
    %102 = arith.select %70, %101, %99 : vector<8x256xi1>, vector<8x256xf32>
    %103 = vector.shape_cast %19 : vector<1x256xf32> to vector<1x256xf32>
    %104 = vector.broadcast %103 : vector<1x256xf32> to vector<8x256xf32>
    %105 = arith.select %68, %104, %102 : vector<8x256xi1>, vector<8x256xf32>
    %106 = arith.index_cast %c0_i32 : i32 to index
    %c0_17 = arith.constant 0 : index
    %c0_18 = arith.constant 0 : index
    %107 = vector.load %arg2[%106, %c0_17, %c0_18] : memref<1x8x256xf32, #tpu.memory_space<vmem>>, vector<1x8x256xf32>
    %108 = vector.shape_cast %107 : vector<1x8x256xf32> to vector<8x256xf32>
    %109 = vector.shape_cast %105 : vector<8x256xf32> to vector<1x8x256xf32>
    tpu.vector_store %arg2[%106, %c0_17, %c0_18], %109 {strides = array<i32>} : memref<1x8x256xf32, #tpu.memory_space<vmem>>, vector<1x8x256xf32>,
    %c1_i32_19 = arith.constant 1 : i32
    return
  }
  func.func @transform_0(%arg0: i32) -> (i32, i32) {
    %c0_i32 = arith.constant 0 : i32
    %c0_i32_0 = arith.constant 0 : i32
    return %arg0, %c0_i32 : i32, i32
  }
  func.func @transform_1(%arg0: i32) -> (i32, i32, i32) {
    %c0_i32 = arith.constant 0 : i32
    %c0_i32_0 = arith.constant 0 : i32
    %c0_i32_1 = arith.constant 0 : i32
    return %arg0, %c0_i32, %c0_i32_0 : i32, i32, i32
  }
}

</mosaic_0001>

<bundles_post_ra>
// kernel: tpu_custom_call.1
= control target key start
LH: loop header
LB: loop body
LE: loop exit
PB: predicated region body
PF: predicated region fallthrough
CT: control target
= control target key end

     0   :  { %vm69_vm0 = vcmask 261120   ;;  %s3835_s0 = inlined_call_operand.vmem [shape: f32[256,32], index: 0, kind: input, shape index: {}]   ;;  %s3836_s1 = inlined_call_operand.hbm [shape: f32[1,8,256], index: 1, kind: output, shape index: {}]  }
   0x1   :  { %v53_v0 = vld [vmem:[%s3835_s0 + $0x80] sm:$0xff]  ;;  %v54_v1 = vld [vmem:[%s3835_s0 + $0x88] sm:$0xff]  ;;  %v55_v7 = vld [vmem:[%s3835_s0 + $0x90] sm:$0xff] }
   0x2   :  { %v37_v2 = vld [vmem:[%s3835_s0] sm:$0xff]  ;;  %v2748_v3 = vsel %vm69_vm0, %v53_v0, 0  ;;  %v2751_v4 = vsel %vm69_vm0, %v54_v1, 0  ;;  %v38_v5 = vld [vmem:[%s3835_s0 + $0x8] sm:$0xff]  ;;  %v56_v8 = vld [vmem:[%s3835_s0 + $0x98] sm:$0xff]  ;;  %v2776_v15 = vsel %vm69_vm0, %v55_v7, 0 }
   0x3   :  { %v2757_v6 = vsel %vm69_vm0, %v37_v2, 0  ;;  %v230_v9 = vand.u32 4294901760, %v2748_v3  ;;  %v233_v10 = vand.u32 4294901760, %v2751_v4  ;;  %v2768_v11 = vsel %vm69_vm0, %v38_v5, 0  ;;  %v39_v13 = vld [vmem:[%s3835_s0 + $0x10] sm:$0xff]  ;;  %v40_v17 = vld [vmem:[%s3835_s0 + $0x18] sm:$0xff] }
   0x4   :  { %v182_v12 = vand.u32 4294901760, %v2757_v6  ;;  %v185_v14 = vand.u32 4294901760, %v2768_v11  ;;  %v2779_v16 = vsel %vm69_vm0, %v56_v8, 0  ;;  %v57_v18 = vld [vmem:[%s3835_s0 + $0xa0] sm:$0xff]  ;;  %v58_v19 = vld [vmem:[%s3835_s0 + $0xa8] sm:$0xff]  ;;  %v2797_v21 = vsel %vm69_vm0, %v39_v13, 0 }
   0x5   :  { %v2794_v20 = vpack.c.bf16 %v233_v10, %v230_v9  ;;  %v236_v23 = vand.u32 4294901760, %v2776_v15  ;;  %v239_v24 = vand.u32 4294901760, %v2779_v16  ;;  %v2810_v25 = vsel %vm69_vm0, %v40_v17, 0  ;;  %v41_v33 = vld [vmem:[%s3835_s0 + $0x20] sm:$0xff]  ;;  %v42_v34 = vld [vmem:[%s3835_s0 + $0x28] sm:$0xff]  ;;  %v59_v35 = vld [vmem:[%s3835_s0 + $0xb0] sm:$0xff] }
   0x6   :  { %v2803_v22 = vpack.c.bf16 %v185_v14, %v182_v12  ;;  %v2813_v26 = vsel %vm69_vm0, %v57_v18, 0  ;;  %v2816_v27 = vsel %vm69_vm0, %v58_v19, 0  ;;  %v188_v29 = vand.u32 4294901760, %v2797_v21  ;;  %v60_v36 = vld [vmem:[%s3835_s0 + $0xb8] sm:$0xff] }
   0x7   :  { %3884 = vst [vmem:[#allocation5_spill] sm:$0xff] %v2794_v20  ;;  %2393 = vmatprep.subr.bf16.mxu1 %v2794_v20  ;;  %2489 = vmatprep.subr.bf16.mxu0 %v2794_v20  ;;  %v2824_v28 = vpack.c.bf16 %v239_v24, %v236_v23  ;;  %v191_v30 = vand.u32 4294901760, %v2810_v25  ;;  %v242_v31 = vand.u32 4294901760, %v2813_v26  ;;  %v245_v32 = vand.u32 4294901760, %v2816_v27 }
   0x8   :  { %3885 = vst [vmem:[#allocation6_spill] sm:$0xff] %v2803_v22  ;;  %2395 = vmatpush3.bf16.xpose.msra.mxu1 %v2803_v22  ;;  %2491 = vmatpush3.bf16.xpose.msra.mxu0 %v2803_v22  ;;  %v2857_v39 = vsel %vm69_vm0, %v41_v33, 0  ;;  %v2860_v40 = vsel %vm69_vm0, %v42_v34, 0 }
   0x9   :  { %3886 = vst [vmem:[#allocation7_spill] sm:$0xff] %v2824_v28  ;;  %2397 = vmatprep.subr.bf16.mxu1 %v2824_v28  ;;  %2493 = vmatprep.subr.bf16.mxu0 %v2824_v28  ;;  %v2848_v37 = vpack.c.bf16 %v191_v30, %v188_v29  ;;  %v2854_v38 = vpack.c.bf16 %v245_v32, %v242_v31 }
   0xb   :  { %3887 = vst [vmem:[#allocation8_spill] sm:$0xff] %v2848_v37  ;;  %3888 = vst [vmem:[#allocation9_spill] sm:$0xff] %v2854_v38 }
   0xc   :  { %6 = vsyncpa [#allocation3], 0  ;;  %v2863_v41 = vsel %vm69_vm0, %v59_v35, 0  ;;  %v2866_v42 = vsel %vm69_vm0, %v60_v36, 0  ;;  %v194_v43 = vand.u32 4294901760, %v2857_v39  ;;  %v197_v44 = vand.u32 4294901760, %v2860_v40 }
   0xd   :  { %v248_v45 = vand.u32 4294901760, %v2863_v41  ;;  %v3847_v46 = vand.u32 4294901760, %v2866_v42  ;;  %v43_v47 = vld [vmem:[%s3835_s0 + $0x30] sm:$0xff]  ;;  %v44_v48 = vld [vmem:[%s3835_s0 + $0x38] sm:$0xff]  ;;  %v61_v49 = vld [vmem:[%s3835_s0 + $0xc0] sm:$0xff]  ;;  %v9_v59 = vlaneseq  ;;  %v3837_v33 = vmov 0.0  }
   0xe   :  { %v62_v50 = vld [vmem:[%s3835_s0 + $0xc8] sm:$0xff]  ;;  %v2892_v51 = vpack.c.bf16 %v197_v44, %v194_v43  ;;  %v2901_v53 = vsel %vm69_vm0, %v43_v47, 0  ;;  %v2904_v54 = vsel %vm69_vm0, %v44_v48, 0  ;;  %v2907_v55 = vsel %vm69_vm0, %v61_v49, 0  ;;  %v45_v62 = vld [vmem:[%s3835_s0 + $0x40] sm:$0xff]  ;;  %v63_v0 = vld [vmem:[%s3835_s0 + $0xd0] sm:$0xff] }
   0xf   :  { %v2898_v52 = vpack.c.bf16 %v3847_v46, %v248_v45  ;;  %v2910_v56 = vsel %vm69_vm0, %v62_v50, 0  ;;  %v3842_v57 = vand.u32 4294901760, %v2901_v53  ;;  %v3841_v58 = vand.u32 4294901760, %v2904_v54  ;;  %v46_v63 = vld [vmem:[%s3835_s0 + $0x48] sm:$0xff]  ;;  %v64_v1 = vld [vmem:[%s3835_s0 + $0xd8] sm:$0xff] }
  0x10   :  { %2399 = vmatpush3.bf16.xpose.msra.mxu1 %v2848_v37  ;;  %2495 = vmatpush3.bf16.xpose.msra.mxu0 %v2848_v37  ;;  %3889 = vst [vmem:[#allocation10_spill] sm:$0xff] %v2892_v51  ;;  %v3840_v60 = vand.u32 4294901760, %v2907_v55  ;;  %v3839_v61 = vand.u32 4294901760, %v2910_v56  ;;  %v2938_v5 = vshrl.u32 %v9_v59, 7  ;;  %v2940_v7 = vand.u32 127, %v9_v59  ;;  %v47_v59 = vld [vmem:[%s3835_s0 + $0x50] sm:$0xff] }
  0x11   :  { %2401 = vmatprep.subr.bf16.mxu1 %v2854_v38  ;;  %2497 = vmatprep.subr.bf16.mxu0 %v2854_v38  ;;  %3890 = vst [vmem:[#allocation11_spill] sm:$0xff] %v2898_v52  ;;  %v2936_v2 = vpack.c.bf16 %v3841_v58, %v3842_v57  ;;  %v2949_v13 = vsel %vm69_vm0, %v45_v62, 0  ;;  %v2952_v17 = vsel %vm69_vm0, %v46_v63, 0  ;;  %v2955_v18 = vsel %vm69_vm0, %v63_v0, 0  ;;  %v48_v62 = vld [vmem:[%s3835_s0 + $0x58] sm:$0xff]  ;;  %v65_v63 = vld [vmem:[%s3835_s0 + $0xe0] sm:$0xff] }
  0x12   :  { %3892 = vst [vmem:[#allocation13_spill] sm:$0xff] %v2938_v5  ;;  %v2946_v8 = vpack.c.bf16 %v3839_v61, %v3840_v60  ;;  %v2958_v19 = vsel %vm69_vm0, %v64_v1, 0  ;;  %vm17_vm1 = vcmp.eq.s32.totalorder %v2938_v5, %v2940_v7  ;;  %v3844_v35 = vand.u32 4294901760, %v2949_v13  ;;  %v66_v0 = vld [vmem:[%s3835_s0 + $0xe8] sm:$0xff] }
  0x13   :  { %3891 = vst [vmem:[#allocation12_spill] sm:$0xff] %v2936_v2  ;;  %v2963_v34 = vsel %vm17_vm1, 1.0, %v3837_v33  ;;  %v3843_v36 = vand.u32 4294901760, %v2952_v17  ;;  %v3846_v48 = vand.u32 4294901760, %v2955_v18  ;;  %v3845_v49 = vand.u32 4294901760, %v2958_v19 }
  0x14   :  { %3893 = vst [vmem:[#allocation14_spill] sm:$0xff] %v2946_v8  ;;  %v71_v47 = vsel %vm69_vm0, %v2963_v34, 0  ;;  %v116_v61 = vsel %vm69_vm0, %v47_v59, 0  ;;  %v119_v60 = vsel %vm69_vm0, %v48_v62, 0  ;;  %v170_v57 = vsel %vm69_vm0, %v65_v63, 0 }
  0x15   :  { %v2975_v50 = vsub.f32 %v71_v47, %v71_v47  ;;  %v2996_v47 = vpack.c.bf16 %v3843_v36, %v3844_v35  ;;  %v3002_v33 = vpack.c.bf16 %v3845_v49, %v3846_v48  ;;  %v3011_v36 = vsel %vm69_vm0, %v66_v0, 0 }
  0x16   :  { %v212_v49 = vand.u32 4294901760, %v116_v61  ;;  %v215_v59 = vand.u32 4294901760, %v119_v60  ;;  %v266_v62 = vand.u32 4294901760, %v170_v57  ;;  %v269_v48 = vand.u32 4294901760, %v3011_v36 }
  0x17   :  { %3894 = vst [vmem:[#allocation15_spill] sm:$0xff] %v2975_v50  ;;  %v2990_v1 = vand.u32 4294901760, %v2975_v50  ;;  %3895 = vst [vmem:[#allocation16_spill] sm:$0xff] %v2996_v47  ;;  %v3023_v63 = vsub.f32 %v2748_v3, %v230_v9  ;;  %v3033_v0 = vsub.f32 %v2757_v6, %v182_v12  ;;  %v3038_v46 = vsub.f32 %v2768_v11, %v185_v14  ;;  %v49_v3 = vld [vmem:[%s3835_s0 + $0x60] sm:$0xff]  ;;  %v50_v9 = vld [vmem:[%s3835_s0 + $0x68] sm:$0xff] }
  0x18   :  { %2403 = vmatpush3.bf16.xpose.msra.mxu1 %v2892_v51  ;;  %2499 = vmatpush3.bf16.xpose.msra.mxu0 %v2892_v51  ;;  %3896 = vst [vmem:[#allocation17_spill] sm:$0xff] %v3002_v33  ;;  %v3055_v6 = vsub.f32 %v2779_v16, %v239_v24  ;;  %v3065_v11 = vsub.f32 %v2810_v25, %v191_v30  ;;  %v67_v12 = vld [vmem:[%s3835_s0 + $0xf0] sm:$0xff]  ;;  %v68_v14 = vld [vmem:[%s3835_s0 + $0xf8] sm:$0xff]  ;;  %v3222_v22 = vadd.s32 16, %v2938_v5 }
  0x19   :  { %2405 = vmatprep.subr.bf16.mxu1 %v2898_v52  ;;  %2501 = vmatprep.subr.bf16.mxu0 %v2898_v52  ;;  %v281_v58 = vsub.f32 %v2975_v50, %v2990_v1  ;;  %v3081_v16 = vsub.f32 %v2816_v27, %v245_v32  ;;  %v3093_v24 = vsub.f32 %v2860_v40, %v197_v44  ;;  %v51_v27 = vld [vmem:[%s3835_s0 + $0x70] sm:$0xff]  ;;  %v179_v40 = vsel %vm69_vm0, %v68_v14, 0 }
  0x1a   :  { %2298 = vmatprep.mubr.f32.mxu0 %v2990_v1  ;;  %v3095_v25 = vpack.c.bf16 %v269_v48, %v266_v62  ;;  %v3105_v30 = vsub.f32 %v2863_v41, %v248_v45  ;;  %v3900_v44 = vand.u32 4294901760, %v2901_v53  ;;  %v3901_v41 = vand.u32 4294901760, %v2904_v54  ;;  %3914 = vst [vmem:[#allocation25_spill] sm:$0xff] %v3222_v22 }
  0x1b   :  { %v3013_v35 = vand.u32 4294901760, %v281_v58  ;;  %v3028_v58 = vsub.f32 %v2751_v4, %v233_v10  ;;  %v3050_v4 = vsub.f32 %v2776_v15, %v236_v23  ;;  %v3060_v10 = vsub.f32 %v2797_v21, %v188_v29 }
  0x1c   :  { %v3076_v15 = vsub.f32 %v2813_v26, %v242_v31  ;;  %v3086_v21 = vsub.f32 %v2857_v39, %v194_v43  ;;  %v3088_v23 = vpack.c.bf16 %v215_v59, %v212_v49  ;;  %3898 = vst [vmem:[#allocation19_spill] sm:$0xff] %v3095_v25  ;;  %v122_v26 = vsel %vm69_vm0, %v49_v3, 0  ;;  %v52_v43 = vld [vmem:[%s3835_s0 + $0x78] sm:$0xff]  ;;  %s2727_s0 = smov [#allocation2]  }
  0x1d   :  { %2172 = vmatprep.mubr.f32.mxu1 %v3013_v35  ;;  %v125_v29 = vsel %vm69_vm0, %v50_v9, 0  ;;  %v3899_v31 = vand.u32 4294901760, %v2866_v42  ;;  %v176_v39 = vsel %vm69_vm0, %v67_v12, 0  ;;  %v3120_v3 = vsub.f32 %v2901_v53, %v3900_v44  ;;  %s2114_s12 = sshll.u32 %s2727_s0, 4  ;;  %s2115_s12 = int_to_ptr.vmem [resolvable:$true] %s2114_s12 }
  0x1e   :  { %3897 = vst [vmem:[#allocation18_spill] sm:$0xff] %v3088_v23  ;;  %v3125_v45 = vsub.f32 %v2904_v54, %v3901_v41  ;;  %v3903_v12 = vand.u32 4294901760, %v2910_v56  ;;  %v218_v53 = vand.u32 4294901760, %v122_v26  ;;  %v128_v44 = vsel %vm69_vm0, %v51_v27, 0  ;;  %s2700_s13 = scalar_lea.vmem %s2115_s12, 256  ;;  %p2705_p1 = scmp.lt.s32.totalorder %s2115_s12, %s2115_s12 }
  0x1f   :  { %v3110_v32 = vsub.f32 %v2866_v42, %v3899_v31  ;;  %v3902_v42 = vand.u32 4294901760, %v2907_v55  ;;  %v221_v31 = vand.u32 4294901760, %v125_v29  ;;  %v448_v54 = vand.u32 4294901760, %v3023_v63  ;;  %p2701_p0 = scmp.ne.s32.totalorder %s2115_s12, %s2700_s13  ;;  %p2706_p2 = scmp.lt.s32.totalorder %s2700_s13, %s2700_s13 }
  0x20   :  { %2407 = vmatpush3.bf16.xpose.msra.mxu1 %v2936_v2  ;;  %2503 = vmatpush3.bf16.xpose.msra.mxu0 %v2936_v2  ;;  %v3135_v14 = vsub.f32 %v2910_v56, %v3903_v12  ;;  %v275_v41 = vand.u32 4294901760, %v179_v40  ;;  %v455_v56 = vand.u32 4294901760, %v3028_v58  ;;  %v3904_v12 = vand.u32 4294901760, %v2949_v13 }
  0x21   :  { %2409 = vmatprep.subr.bf16.mxu1 %v2946_v8  ;;  %2505 = vmatprep.subr.bf16.mxu0 %v2946_v8  ;;  %v3130_v9 = vsub.f32 %v2907_v55, %v3902_v42  ;;  %v272_v55 = vand.u32 4294901760, %v176_v39  ;;  %v131_v42 = vsel %vm69_vm0, %v52_v43, 0  ;;  %v3907_v8 = vand.u32 4294901760, %v2958_v19  ;;  %p2707_p3 = por %p2706_p2, %p2705_p1 }
  0x22   :  { %v3165_v2 = vsub.f32 %v116_v61, %v212_v49  ;;  %v3167_v50 = vsub.f32 %v119_v60, %v215_v59  ;;  %v227_v52 = vand.u32 4294901760, %v131_v42  ;;  %v456_v61 = vsub.f32 %v3028_v58, %v455_v56 }
  0x23   :  { %v3163_v43 = vsub.f32 %v2958_v19, %v3907_v8  ;;  %v3178_v51 = vpack.c.bf16 %v275_v41, %v272_v55  ;;  %v343_v60 = vand.u32 4294901760, %v3038_v46  ;;  %v3182_v8 = vsub.f32 %v122_v26, %v218_v53  ;;  %p2708_p4 = pnand %p2707_p3, %p2701_p0 }
  0x24   :  { %v3186_v19 = vsub.f32 %v176_v39, %v272_v55  ;;  %v3189_v49 = vadd.s32 8, %v2938_v5  ;;  %v3191_v59 = vsub.f32 %v179_v40, %v275_v41  ;;  %v457_v40 = vand.u32 4294901760, %v456_v61 }
  0x25   :  { %3909 = vst [vmem:[#allocation21_spill] sm:$0xff] %v3178_v51  ;;  %v3912_v55 = vmov 0.0   ;;  %v3873_v28 = vand.u32 4294901760, %v3076_v15  ;;  %vm19_vm3 = vcmp.eq.s32.totalorder %v3222_v22, %v2940_v7 }
  0x26   :  { %3910 = vst [vmem:[#allocation22_spill] sm:$0xff] %v3189_v49  ;;  %vm18_vm2 = vcmp.eq.s32.totalorder %v3189_v49, %v2940_v7 }
  0x27   :  { %v3209_v41 = vsel %vm18_vm2, 1.0, %v3912_v55 }
  0x28   :  { %2411 = vmatpush3.bf16.xpose.msra.mxu1 %v2996_v47  ;;  %2507 = vmatpush3.bf16.xpose.msra.mxu0 %v2996_v47  ;;  %v3906_v47 = vand.u32 4294901760, %v2955_v18  ;;  %3913 = vst [vmem:[#allocation24_spill] sm:$0xff] %v3209_v41 }
  0x29   :  { %2413 = vmatprep.subr.bf16.mxu1 %v3002_v33  ;;  %2509 = vmatprep.subr.bf16.mxu0 %v3002_v33  ;;  %v3905_v33 = vand.u32 4294901760, %v2952_v17 }
  0x2b   :  { %v3153_v27 = vsub.f32 %v2952_v17, %v3905_v33  ;;  %v3172_v17 = vpack.c.bf16 %v221_v31, %v218_v53  ;;  %v224_v33 = vand.u32 4294901760, %v128_v44  ;;  %v344_v53 = vsub.f32 %v3038_v46, %v343_v60 }
  0x2d   :  { %3908 = vst [vmem:[#allocation20_spill] sm:$0xff] %v3172_v17  ;;  %v3198_v26 = vpack.c.bf16 %v227_v52, %v224_v33 }
  0x2f   :  { %3911 = vst [vmem:[#allocation23_spill] sm:$0xff] %v3198_v26 }
  0x30   :  { %2415 = vmatpush3.bf16.xpose.msra.mxu1 %v3088_v23  ;;  %2511 = vmatpush3.bf16.xpose.msra.mxu0 %v3088_v23  ;;  %v3148_v23 = vsub.f32 %v2949_v13, %v3904_v12  ;;  %v3169_v13 = vsub.f32 %v170_v57, %v266_v62  ;;  %v336_v12 = vand.u32 4294901760, %v3033_v0  ;;  %v3184_v57 = vsub.f32 %v125_v29, %v221_v31 }
  0x31   :  { %2417 = vmatprep.subr.bf16.mxu1 %v3095_v25  ;;  %2513 = vmatprep.subr.bf16.mxu0 %v3095_v25  ;;  %v3158_v25 = vsub.f32 %v2955_v18, %v3906_v47  ;;  %v449_v18 = vsub.f32 %v3023_v63, %v448_v54  ;;  %v3176_v47 = vsub.f32 %v3011_v36, %v269_v48  ;;  %v462_v48 = vand.u32 4294901760, %v3050_v4 }
  0x32   :  { %v337_v36 = vsub.f32 %v3033_v0, %v336_v12  ;;  %v469_v62 = vand.u32 4294901760, %v3055_v6  ;;  %v3200_v29 = vsub.f32 %v128_v44, %v224_v33  ;;  %v350_v31 = vand.u32 4294901760, %v3060_v10 }
  0x33   :  { %v450_v39 = vand.u32 4294901760, %v449_v18  ;;  %v2520_v44 = vpack.c.bf16 %v455_v56, %v448_v54  ;;  %v357_v33 = vand.u32 4294901760, %v3065_v11  ;;  %v74_v18 = vsel %vm69_vm0, %v3209_v41, 0 }
  0x34   :  { %v338_v49 = vand.u32 4294901760, %v337_v36  ;;  %v463_v38 = vsub.f32 %v3050_v4, %v462_v48  ;;  %v470_v61 = vsub.f32 %v3055_v6, %v469_v62  ;;  %v2522_v37 = vpack.c.bf16 %v343_v60, %v336_v12 }
  0x35   :  { %v2424_v54 = vpack.c.bf16 %v457_v40, %v450_v39  ;;  %v2524_v56 = vpack.c.bf16 %v469_v62, %v462_v48  ;;  %v351_v36 = vsub.f32 %v3060_v10, %v350_v31  ;;  %v358_v41 = vsub.f32 %v3065_v11, %v357_v33 }
  0x36   :  { %v464_v12 = vand.u32 4294901760, %v463_v38  ;;  %v471_v60 = vand.u32 4294901760, %v470_v61  ;;  %v3245_v48 = vsub.f32 %v3076_v15, %v3873_v28  ;;  %v3880_v28 = vand.u32 4294901760, %v3086_v21 }
  0x37   :  { %v359_v22 = vand.u32 4294901760, %v358_v41  ;;  %v3917_v41 = vand.u32 4294901760, %v3081_v16 }
  0x38   :  { %2419 = vmatpush3.bf16.xpose.msra.mxu1 %v3172_v17  ;;  %2515 = vmatpush3.bf16.xpose.msra.mxu0 %v3172_v17  ;;  %v3211_v17 = vsub.f32 %v131_v42, %v227_v52  ;;  %v3225_v52 = vadd.s32 24, %v2938_v5  ;;  %v345_v42 = vand.u32 4294901760, %v344_v53 }
  0x39   :  { %2421 = vmatprep.subr.bf16.mxu1 %v3178_v51  ;;  %2517 = vmatprep.subr.bf16.mxu0 %v3178_v51  ;;  %v3218_v51 = vsub.f32 %v74_v18, %v74_v18  ;;  %v3235_v18 = vsel %vm19_vm3, 1.0, %v3912_v55 }
  0x3a   :  { %3915 = vst [vmem:[#allocation26_spill] sm:$0xff] %v3225_v52  ;;  %vm20_vm4 = vcmp.eq.s32.totalorder %v3225_v52, %v2940_v7  ;;  %v77_v38 = vsel %vm69_vm0, %v3235_v18, 0  ;;  %v2426_v40 = vpack.c.bf16 %v345_v42, %v338_v49  ;;  %v352_v52 = vand.u32 4294901760, %v351_v36 }
  0x3b   :  { %v291_v20 = vand.u32 4294901760, %v3218_v51  ;;  %v3238_v39 = vsel %vm20_vm4, 1.0, %v3912_v55  ;;  %v3252_v53 = vsub.f32 %v77_v38, %v77_v38  ;;  %v478_v42 = vand.u32 4294901760, %v3245_v48 }
  0x3c   :  { %3916 = vst [vmem:[#allocation27_spill] sm:$0xff] %v3238_v39  ;;  %v80_v7 = vsel %vm69_vm0, %v3238_v39, 0  ;;  %v484_v36 = vsub.f32 %v3081_v16, %v3917_v41  ;;  %v3918_v48 = vand.u32 4294901760, %v3093_v24  ;;  %v504_v49 = vand.u32 4294901760, %v3130_v9 }
  0x3d   :  { %v3254_v61 = vsub.f32 %v80_v7, %v80_v7  ;;  %v292_v5 = vsub.f32 %v3218_v51, %v291_v20  ;;  %v302_v55 = vand.u32 4294901760, %v3252_v53 }
  0x3e   :  { %v372_v41 = vsub.f32 %v3093_v24, %v3918_v48 }
  0x3f   :  { %v303_v38 = vsub.f32 %v3252_v53, %v302_v55  ;;  %v3269_v7 = vand.u32 4294901760, %v3254_v61 }
  0x40   :  { %2423 = vmatpush3.bf16.xpose.msra.mxu1 %v3198_v26  ;;  %2519 = vmatpush3.bf16.xpose.msra.mxu0 %v3198_v26  ;;  %v2725_v26 = vmov 0  }
  0x41   :  { %2425 = vmatprep.subr.bf16.mxu1 %v2424_v54  ;;  %2521 = vmatprep.subr.bf16.mxu0 %v2520_v44  ;;  %v83_v39 = vsel %vm69_vm0, 1.0, %v2725_v26  ;;  %v2428_v44 = vpack.c.bf16 %v471_v60, %v464_v12  ;;  %v2526_v54 = vpack.c.bf16 %v357_v33, %v350_v31  ;;  %v3278_v31 = vsub.f32 %v3086_v21, %v3880_v28 }
  0x42   :  { %v3271_v62 = vsub.f32 %v83_v39, %v83_v39  ;;  %v490_v33 = vand.u32 4294901760, %v3105_v30  ;;  %v293_v12 = vand.u32 4294901760, %v292_v5  ;;  %v2430_v39 = vpack.c.bf16 %v359_v22, %v352_v52 }
  0x43   :  { %v497_v26 = vand.u32 4294901760, %v3110_v32  ;;  %v304_v5 = vand.u32 4294901760, %v303_v38  ;;  %v314_v52 = vsub.f32 %v3254_v61, %v3269_v7  ;;  %v413_v60 = vand.u32 4294901760, %v3167_v50 }
  0x44   :  { %v3292_v28 = vand.u32 4294901760, %v3271_v62 }
  0x45   :  { %v315_v22 = vand.u32 4294901760, %v314_v52  ;;  %v511_v52 = vand.u32 4294901760, %v3135_v14 }
  0x46   :  { %v325_v38 = vsub.f32 %v3271_v62, %v3292_v28 }
  0x47   :  { %2173 = vmatmul.mubr.f32.vlgmr.msra.gmra.mrb[0].mxu1 %v3013_v35  ;;  %2299 = vmatmul.mubr.f32.vlgmr.msra.gmra.mrb[0].mxu0 %v2990_v1  ;;  %v485_v1 = vand.u32 4294901760, %v484_v36  ;;  %v366_v35 = vand.u32 4294901760, %v3278_v31 }
  0x48   :  { %2427 = vmatpush3.bf16.xpose.msra.mxu1 %v2426_v40  ;;  %2523 = vmatpush3.bf16.xpose.msra.mxu0 %v2522_v37  ;;  %v491_v37 = vsub.f32 %v3105_v30, %v490_v33  ;;  %v498_v40 = vsub.f32 %v3110_v32, %v497_v26  ;;  %v3333_v48 = vand.u32 4294901760, %v325_v38  ;;  %v505_v38 = vsub.f32 %v3130_v9, %v504_v49 }
  0x49   :  { %2429 = vmatprep.subr.bf16.mxu1 %v2428_v44  ;;  %2525 = vmatprep.subr.bf16.mxu0 %v2524_v56  ;;  %v3919_v44 = vand.u32 4294901760, %v3076_v15  ;;  %v3920_v56 = vand.u32 4294901760, %v3081_v16 }
  0x4a   :  { %2174 = vmatprep.mubr.f32.mxu1 %v293_v12  ;;  %2300 = vmatprep.mubr.f32.mxu0 %v291_v20 }
  0x4b   :  { %2175 = vmatmul.mubr.f32.gmra.mrb[2].mxu1 %v293_v12  ;;  %2301 = vmatmul.mubr.f32.gmra.mrb[2].mxu0 %v291_v20  ;;  %v2432_v12 = vpack.c.bf16 %v485_v1, %v478_v42  ;;  %v2528_v36 = vpack.c.bf16 %v3920_v56, %v3919_v44  ;;  %v373_v20 = vand.u32 4294901760, %v372_v41  ;;  %v378_v42 = vand.u32 4294901760, %v3120_v3 }
  0x4c   :  { %2176 = vmatprep.mubr.f32.mxu1 %v304_v5  ;;  %2302 = vmatprep.mubr.f32.mxu0 %v302_v55  ;;  %v385_v1 = vand.u32 4294901760, %v3125_v45  ;;  %v492_v56 = vand.u32 4294901760, %v491_v37  ;;  %v499_v44 = vand.u32 4294901760, %v498_v40  ;;  %v2532_v37 = vpack.c.bf16 %v497_v26, %v490_v33 }
  0x4d   :  { %v379_v41 = vsub.f32 %v3120_v3, %v378_v42  ;;  %v518_v33 = vand.u32 4294901760, %v3158_v25 }
  0x4e   :  { %v2436_v40 = vpack.c.bf16 %v499_v44, %v492_v56  ;;  %v525_v56 = vand.u32 4294901760, %v3163_v43 }
  0x4f   :  { %2177 = vmatmul.mubr.f32.gmra.mrb[4].mxu1 %v304_v5  ;;  %2303 = vmatmul.mubr.f32.gmra.mrb[4].mxu0 %v302_v55  ;;  %v3921_v55 = vand.u32 4294901760, %v3086_v21  ;;  %v386_v5 = vsub.f32 %v3125_v45, %v385_v1 }
  0x50   :  { %2431 = vmatpush3.bf16.xpose.msra.mxu1 %v2430_v39  ;;  %2527 = vmatpush3.bf16.xpose.msra.mxu0 %v2526_v54  ;;  %v3922_v54 = vand.u32 4294901760, %v3093_v24  ;;  %v2434_v39 = vpack.c.bf16 %v373_v20, %v366_v35  ;;  %v399_v20 = vand.u32 4294901760, %v3153_v27 }
  0x51   :  { %2433 = vmatprep.subr.bf16.mxu1 %v2432_v12  ;;  %2529 = vmatprep.subr.bf16.mxu0 %v2528_v36  ;;  %v512_v36 = vsub.f32 %v3135_v14, %v511_v52  ;;  %v387_v35 = vand.u32 4294901760, %v386_v5  ;;  %v506_v12 = vand.u32 4294901760, %v505_v38  ;;  %v519_v5 = vsub.f32 %v3158_v25, %v518_v33 }
  0x52   :  { %2178 = vmatprep.mubr.f32.mxu1 %v315_v22  ;;  %2304 = vmatprep.mubr.f32.mxu0 %v3269_v7  ;;  %v2530_v31 = vpack.c.bf16 %v3922_v54, %v3921_v55  ;;  %v2534_v55 = vpack.c.bf16 %v385_v1, %v378_v42 }
  0x53   :  { %2179 = vmatmul.mubr.f32.gmra.mrb[6].mxu1 %v315_v22  ;;  %2305 = vmatmul.mubr.f32.gmra.mrb[6].mxu0 %v3269_v7  ;;  %v380_v7 = vand.u32 4294901760, %v379_v41  ;;  %v392_v22 = vand.u32 4294901760, %v3148_v23  ;;  %v513_v26 = vand.u32 4294901760, %v512_v36  ;;  %v2536_v41 = vpack.c.bf16 %v511_v52, %v504_v49 }
  0x54   :  { %2180 = vmatprep.mubr.f32.mxu1 %v3333_v48  ;;  %2306 = vmatprep.mubr.f32.mxu0 %v3292_v28  ;;  %v406_v36 = vand.u32 4294901760, %v3165_v2  ;;  %v520_v42 = vand.u32 4294901760, %v519_v5  ;;  %v539_v49 = vand.u32 4294901760, %v3176_v47  ;;  %v420_v5 = vand.u32 4294901760, %v3182_v8 }
  0x55   :  { %v2438_v44 = vpack.c.bf16 %v387_v35, %v380_v7  ;;  %v393_v54 = vsub.f32 %v3148_v23, %v392_v22  ;;  %v532_v7 = vand.u32 4294901760, %v3169_v13  ;;  %v2538_v35 = vpack.c.bf16 %v399_v20, %v392_v22 }
  0x57   :  { %2181 = vmatmul.mubr.f32.gmra.mrb[8].mxu1 %v3333_v48  ;;  %2307 = vmatmul.mubr.f32.gmra.mrb[8].mxu0 %v3292_v28 }
  0x58   :  { %2435 = vmatpush3.bf16.xpose.msra.mxu1 %v2434_v39  ;;  %2531 = vmatpush3.bf16.xpose.msra.mxu0 %v2530_v31  ;;  %v400_v31 = vsub.f32 %v3153_v27, %v399_v20  ;;  %v2440_v39 = vpack.c.bf16 %v513_v26, %v506_v12  ;;  %v407_v12 = vsub.f32 %v3165_v2, %v406_v36 }
  0x59   :  { %2437 = vmatprep.subr.bf16.mxu1 %v2436_v40  ;;  %2533 = vmatprep.subr.bf16.mxu0 %v2532_v37  ;;  %v526_v40 = vsub.f32 %v3163_v43, %v525_v56  ;;  %v394_v37 = vand.u32 4294901760, %v393_v54  ;;  %v414_v26 = vsub.f32 %v3167_v50, %v413_v60  ;;  %v533_v54 = vsub.f32 %v3169_v13, %v532_v7 }
  0x5a   :  { %2214 = vmatprep.mubr.msk.f32.mxu1 %vm69_vm0, %v2963_v34  ;;  %2340 = vmatprep.mubr.msk.f32.mxu0 %vm69_vm0, %v2963_v34  ;;  %v401_v38 = vand.u32 4294901760, %v400_v31  ;;  %v540_v31 = vsub.f32 %v3176_v47, %v539_v49 }
  0x5b   :  { %v527_v1 = vand.u32 4294901760, %v526_v40  ;;  %v427_v40 = vand.u32 4294901760, %v3184_v57  ;;  %v534_v22 = vand.u32 4294901760, %v533_v54  ;;  %v434_v54 = vand.u32 4294901760, %v3200_v29 }
  0x5c   :  { %v2442_v52 = vpack.c.bf16 %v401_v38, %v394_v37  ;;  %v541_v20 = vand.u32 4294901760, %v540_v31  ;;  %v546_v37 = vand.u32 4294901760, %v3186_v19  ;;  %v2542_v38 = vpack.c.bf16 %v413_v60, %v406_v36 }
  0x5d   :  { %v441_v31 = vand.u32 4294901760, %v3211_v17 }
  0x60   :  { %2439 = vmatpush3.bf16.xpose.msra.mxu1 %v2438_v44  ;;  %2535 = vmatpush3.bf16.xpose.msra.mxu0 %v2534_v55  ;;  %v2444_v44 = vpack.c.bf16 %v527_v1, %v520_v42  ;;  %v2540_v55 = vpack.c.bf16 %v525_v56, %v518_v33  ;;  %v553_v33 = vand.u32 4294901760, %v3191_v59  ;;  %v421_v42 = vsub.f32 %v3182_v8, %v420_v5 }
  0x61   :  { %2441 = vmatprep.subr.bf16.mxu1 %v2440_v39  ;;  %2537 = vmatprep.subr.bf16.mxu0 %v2536_v41  ;;  %v408_v39 = vand.u32 4294901760, %v407_v12  ;;  %v415_v41 = vand.u32 4294901760, %v414_v26  ;;  %v428_v1 = vsub.f32 %v3184_v57, %v427_v40  ;;  %v547_v12 = vsub.f32 %v3186_v19, %v546_v37 }
  0x62   :  { %v554_v26 = vsub.f32 %v3191_v59, %v553_v33 }
  0x63   :  { %v2446_v56 = vpack.c.bf16 %v415_v41, %v408_v39  ;;  %v548_v60 = vand.u32 4294901760, %v547_v12  ;;  %v2546_v41 = vpack.c.bf16 %v427_v40, %v420_v5  ;;  %v3924_v5 = vld [vmem:[#allocation5_spill] sm:$0xff]  ;;  %v3925_v40 = vpack.c.bf16 %v3038_v46, %v3033_v0  ;;  %v3931_v0 = vld [vmem:[#allocation8_spill] sm:$0xff]  ;;  %v3938_v12 = vld [vmem:[#allocation11_spill] sm:$0xff] }
  0x64   :  { %v555_v36 = vand.u32 4294901760, %v554_v26  ;;  %v3930_v46 = vpack.c.bf16 %v3065_v11, %v3060_v10  ;;  %v3881_v10 = vmov 1.0   ;;  %v3935_v11 = vpack.c.bf16 %v3093_v24, %v3086_v21  ;;  %v3939_v26 = vld [vmem:[#allocation15_spill] sm:$0xff]  ;;  %v3943_v24 = vld [vmem:[#allocation14_spill] sm:$0xff] }
  0x65   :  { %v3942_v21 = vpack.c.bf16 %v3135_v14, %v3130_v9  ;;  %v3949_v9 = vld [vmem:[#allocation18_spill] sm:$0xff]  ;;  %v3950_v14 = vpack.c.bf16 %v3176_v47, %v3169_v13  ;;  %v3957_v13 = vld [vmem:[#allocation23_spill] sm:$0xff] }
  0x68   :  { %2443 = vmatpush3.bf16.xpose.msra.mxu1 %v2442_v52  ;;  %2539 = vmatpush3.bf16.xpose.msra.mxu0 %v2538_v35  ;;  %v2448_v52 = vpack.c.bf16 %v541_v20, %v534_v22  ;;  %v2544_v35 = vpack.c.bf16 %v539_v49, %v532_v7  ;;  %v435_v7 = vsub.f32 %v3200_v29, %v434_v54 }
  0x69   :  { %2445 = vmatprep.subr.bf16.mxu1 %v2444_v44  ;;  %2541 = vmatprep.subr.bf16.mxu0 %v2540_v55  ;;  %v422_v44 = vand.u32 4294901760, %v421_v42  ;;  %v429_v55 = vand.u32 4294901760, %v428_v1  ;;  %v442_v49 = vsub.f32 %v3211_v17, %v441_v31  ;;  %v2452_v22 = vpack.c.bf16 %v555_v36, %v548_v60 }
  0x6a   :  { %v2548_v20 = vpack.c.bf16 %v553_v33, %v546_v37  ;;  %v2550_v1 = vpack.c.bf16 %v441_v31, %v434_v54  ;;  %v3926_v37 = vld [vmem:[#allocation6_spill] sm:$0xff]  ;;  %v3927_v33 = vpack.c.bf16 %v3055_v6, %v3050_v4  ;;  %v3932_v4 = vpack.c.bf16 %v3081_v16, %v3076_v15  ;;  %v3933_v6 = vld [vmem:[#allocation9_spill] sm:$0xff] }
  0x6b   :  { %v2450_v39 = vpack.c.bf16 %v429_v55, %v422_v44  ;;  %v3936_v15 = vld [vmem:[#allocation10_spill] sm:$0xff]  ;;  %v3937_v16 = vpack.c.bf16 %v3110_v32, %v3105_v30  ;;  %v3940_v44 = vpack.c.bf16 %v3125_v45, %v3120_v3  ;;  %v3941_v55 = vld [vmem:[#allocation12_spill] sm:$0xff]  ;;  %v3944_v30 = vpack.c.bf16 %v3153_v27, %v3148_v23  ;;  %v3947_v3 = vld [vmem:[#allocation17_spill] sm:$0xff] }
  0x6c   :  { %v3945_v32 = vld [vmem:[#allocation16_spill] sm:$0xff]  ;;  %v3946_v54 = vpack.c.bf16 %v3163_v43, %v3158_v25  ;;  %v3948_v45 = vpack.c.bf16 %v3167_v50, %v3165_v2  ;;  %v3951_v23 = vld [vmem:[#allocation19_spill] sm:$0xff]  ;;  %v3952_v27 = vpack.c.bf16 %v3184_v57, %v3182_v8  ;;  %v3954_v43 = vpack.c.bf16 %v3191_v59, %v3186_v19  ;;  %v3955_v2 = vld [vmem:[#allocation21_spill] sm:$0xff] }
  0x6d   :  { %v3953_v25 = vld [vmem:[#allocation20_spill] sm:$0xff]  ;;  %v3956_v50 = vpack.c.bf16 %v3211_v17, %v3200_v29 }
  0x70   :  { %2447 = vmatpush3.bf16.xpose.msra.mxu1 %v2446_v56  ;;  %2543 = vmatpush3.bf16.xpose.msra.mxu0 %v2542_v38  ;;  %v436_v56 = vand.u32 4294901760, %v435_v7  ;;  %v443_v38 = vand.u32 4294901760, %v442_v49 }
  0x71   :  { %2449 = vmatprep.subr.bf16.mxu1 %v2448_v52  ;;  %2545 = vmatprep.subr.bf16.mxu0 %v2544_v35  ;;  %v3923_v52 = vpack.c.bf16 %v3028_v58, %v3023_v63  ;;  %v3928_v63 = vld [vmem:[#allocation7_spill] sm:$0xff]  ;;  %v3929_v58 = vld [vmem:[#allocation24_spill] sm:$0xff] }
  0x72   :  { %v2454_v42 = vpack.c.bf16 %v443_v38, %v436_v56  ;;  %v3934_v35 = vld [vmem:[#allocation27_spill] sm:$0xff] }
  0x78   :  { %2451 = vmatpush3.bf16.xpose.msra.mxu1 %v2450_v39  ;;  %2547 = vmatpush3.bf16.xpose.msra.mxu0 %v2546_v41 }
  0x79   :  { %2453 = vmatprep.subr.bf16.mxu1 %v2452_v22  ;;  %2549 = vmatprep.subr.bf16.mxu0 %v2548_v20 }
  0x80   :  { %2455 = vmatpush3.bf16.xpose.msra.mxu1 %v2454_v42  ;;  %2551 = vmatpush3.bf16.xpose.msra.mxu0 %v2550_v1 }
  0x81   :  { %2457 = vmatprep.subr.bf16.mxu1 %v3923_v52  ;;  %2553 = vmatprep.subr.bf16.mxu0 %v3924_v5 }
  0x87   :  { %2215 = vmatmul.mubr.msk.f32.vlgmr.msra.gmra.mrb[0].mxu1 %vm69_vm0, %v2963_v34  ;;  %2341 = vmatmul.mubr.msk.f32.vlgmr.msra.gmra.mrb[0].mxu0 %vm69_vm0, %v2963_v34 }
  0x88   :  { %2459 = vmatpush3.bf16.xpose.msra.mxu1 %v3925_v40  ;;  %2555 = vmatpush3.bf16.xpose.msra.mxu0 %v3926_v37 }
  0x89   :  { %2461 = vmatprep.subr.bf16.mxu1 %v3927_v33  ;;  %2557 = vmatprep.subr.bf16.mxu0 %v3928_v63 }
  0x8a   :  { %2216 = vmatprep.mubr.msk.f32.mxu1 %vm69_vm0, %v3929_v58  ;;  %2342 = vmatprep.mubr.msk.f32.mxu0 %vm69_vm0, %v3929_v58 }
  0x8b   :  { %2217 = vmatmul.mubr.msk.f32.gmra.mrb[2].mxu1 %vm69_vm0, %v3929_v58  ;;  %2343 = vmatmul.mubr.msk.f32.gmra.mrb[2].mxu0 %vm69_vm0, %v3929_v58 }
  0x8c   :  { %2218 = vmatprep.mubr.msk.f32.mxu1 %vm69_vm0, %v3235_v18  ;;  %2344 = vmatprep.mubr.msk.f32.mxu0 %vm69_vm0, %v3235_v18 }
  0x8f   :  { %2219 = vmatmul.mubr.msk.f32.gmra.mrb[4].mxu1 %vm69_vm0, %v3235_v18  ;;  %2345 = vmatmul.mubr.msk.f32.gmra.mrb[4].mxu0 %vm69_vm0, %v3235_v18 }
  0x90   :  { %2463 = vmatpush3.bf16.xpose.msra.mxu1 %v3930_v46  ;;  %2559 = vmatpush3.bf16.xpose.msra.mxu0 %v3931_v0 }
  0x91   :  { %2465 = vmatprep.subr.bf16.mxu1 %v3932_v4  ;;  %2561 = vmatprep.subr.bf16.mxu0 %v3933_v6 }
  0x92   :  { %2220 = vmatprep.mubr.msk.f32.mxu1 %vm69_vm0, %v3934_v35  ;;  %2346 = vmatprep.mubr.msk.f32.mxu0 %vm69_vm0, %v3934_v35 }
  0x93   :  { %2221 = vmatmul.mubr.msk.f32.gmra.mrb[6].mxu1 %vm69_vm0, %v3934_v35  ;;  %2347 = vmatmul.mubr.msk.f32.gmra.mrb[6].mxu0 %vm69_vm0, %v3934_v35 }
  0x94   :  { %2222 = vmatprep.mubr.msk.f32.mxu1 %vm69_vm0, %v3881_v10  ;;  %2348 = vmatprep.mubr.msk.f32.mxu0 %vm69_vm0, %v3881_v10 }
  0x97   :  { %2223 = vmatmul.mubr.msk.f32.gmra.mrb[8].mxu1 %vm69_vm0, %v3881_v10  ;;  %2349 = vmatmul.mubr.msk.f32.gmra.mrb[8].mxu0 %vm69_vm0, %v3881_v10 }
  0x98   :  { %2467 = vmatpush3.bf16.xpose.msra.mxu1 %v3935_v11  ;;  %2563 = vmatpush3.bf16.xpose.msra.mxu0 %v3936_v15 }
  0x99   :  { %2469 = vmatprep.subr.bf16.mxu1 %v3937_v16  ;;  %2565 = vmatprep.subr.bf16.mxu0 %v3938_v12 }
  0x9a   :  { %2256 = vmatprep.mubr.f32.mxu1 %v3939_v26  ;;  %2382 = vmatprep.mubr.msk.f32.mxu0 %vm69_vm0, %v2963_v34 }
  0xa0   :  { %2471 = vmatpush3.bf16.xpose.msra.mxu1 %v3940_v44  ;;  %2567 = vmatpush3.bf16.xpose.msra.mxu0 %v3941_v55 }
  0xa1   :  { %2473 = vmatprep.subr.bf16.mxu1 %v3942_v21  ;;  %2569 = vmatprep.subr.bf16.mxu0 %v3943_v24 }
  0xa8   :  { %2475 = vmatpush3.bf16.xpose.msra.mxu1 %v3944_v30  ;;  %2571 = vmatpush3.bf16.xpose.msra.mxu0 %v3945_v32 }
  0xa9   :  { %2477 = vmatprep.subr.bf16.mxu1 %v3946_v54  ;;  %2573 = vmatprep.subr.bf16.mxu0 %v3947_v3 }
  0xb0   :  { %2479 = vmatpush3.bf16.xpose.msra.mxu1 %v3948_v45  ;;  %2575 = vmatpush3.bf16.xpose.msra.mxu0 %v3949_v9 }
  0xb1   :  { %2481 = vmatprep.subr.bf16.mxu1 %v3950_v14  ;;  %2577 = vmatprep.subr.bf16.mxu0 %v3951_v23 }
  0xb8   :  { %2483 = vmatpush3.bf16.xpose.msra.mxu1 %v3952_v27  ;;  %2579 = vmatpush3.bf16.xpose.msra.mxu0 %v3953_v25 }
  0xb9   :  { %2485 = vmatprep.subr.bf16.mxu1 %v3954_v43  ;;  %2581 = vmatprep.subr.bf16.mxu0 %v3955_v2 }
  0xc0   :  { %2487 = vmatpush3.bf16.xpose.msra.mxu1 %v3956_v50  ;;  %2583 = vmatpush3.bf16.xpose.msra.mxu0 %v3957_v13 }
  0xc7   :  { %2257 = vmatmul.mubr.f32.vlgmr.msra.gmra.mrb[0].mxu1 %v3939_v26  ;;  %2383 = vmatmul.mubr.msk.f32.vlgmr.msra.gmra.mrb[0].mxu0 %vm69_vm0, %v2963_v34 }
  0xc8   :  { %2258 = vmatprep.mubr.f32.mxu1 %v3218_v51  ;;  %2384 = vmatprep.mubr.msk.f32.mxu0 %vm69_vm0, %v3929_v58 }
  0xcb   :  { %2259 = vmatmul.mubr.f32.gmra.mrb[2].mxu1 %v3218_v51  ;;  %2385 = vmatmul.mubr.msk.f32.gmra.mrb[2].mxu0 %vm69_vm0, %v3929_v58  ;;  %v3958_v51 = vmov 0.0   ;;  %v3959_v58 = vld [vmem:[#allocation13_spill] sm:$0xff] }
  0xcc   :  { %2260 = vmatprep.mubr.f32.mxu1 %v3252_v53  ;;  %2386 = vmatprep.mubr.msk.f32.mxu0 %vm69_vm0, %v3235_v18  ;;  %v3546_v46 = vsub.s32 0, %v3959_v58 }
  0xcf   :  { %2261 = vmatmul.mubr.f32.gmra.mrb[4].mxu1 %v3252_v53  ;;  %2387 = vmatmul.mubr.msk.f32.gmra.mrb[4].mxu0 %vm69_vm0, %v3235_v18 }
  0xd0   :  { %2262 = vmatprep.mubr.f32.mxu1 %v3254_v61  ;;  %2388 = vmatprep.mubr.msk.f32.mxu0 %vm69_vm0, %v3934_v35 }
  0xd3   :  { %2263 = vmatmul.mubr.f32.gmra.mrb[6].mxu1 %v3254_v61  ;;  %2389 = vmatmul.mubr.msk.f32.gmra.mrb[6].mxu0 %vm69_vm0, %v3934_v35 }
  0xd4   :  { %2264 = vmatprep.mubr.f32.mxu1 %v3271_v62  ;;  %2390 = vmatprep.mubr.msk.f32.mxu0 %vm69_vm0, %v3881_v10 }
  0xd7   :  { %2265 = vmatmul.mubr.f32.gmra.mrb[8].mxu1 %v3271_v62  ;;  %2391 = vmatmul.mubr.msk.f32.gmra.mrb[8].mxu0 %vm69_vm0, %v3881_v10 }
  0xd8   :  { %1366 = vmatprep.mubr.f32.mxu0 %v3958_v51  ;;  %1651 = vmatprep.mubr.f32.mxu1 %v3958_v51 }
 0x19a   :  { %v725_v34 = vpop.f32.mrb[0].mxu1  ;;  %v1199_v17 = vpop.f32.mrb[0].mxu0 }
 0x19b   :  { %v3517_v47 = vadd.f32 %v1199_v17, %v725_v34  ;;  %v727_v8 = vpop.f32.mrb[1].mxu1  ;;  %v1201_v57 = vpop.f32.mrb[1].mxu0 }
 0x19c   :  { %v3519_v19 = vadd.f32 %v1201_v57, %v727_v8 }
 0x19d   :  { %v1853_v0 = vand.u32 2147483647, %v3517_v47 }
 0x19e   :  { %v733_v59 = vpop.f32.mrb[2].mxu1  ;;  %v1206_v29 = vpop.f32.mrb[2].mxu0  ;;  %v1854_v4 = vand.u32 2147483647, %v3519_v19 }
 0x19f   :  { %v3521_v18 = vadd.f32 %v1206_v29, %v733_v59  ;;  %v735_v53 = vpop.f32.mrb[3].mxu1  ;;  %v1208_v61 = vpop.f32.mrb[3].mxu0 }
 0x1a0   :  { %v3523_v31 = vadd.f32 %v1208_v61, %v735_v53 }
 0x1a1   :  { %v1855_v16 = vand.u32 2147483647, %v3521_v18 }
 0x1a2   :  { %v741_v60 = vpop.f32.mrb[4].mxu1  ;;  %v1213_v36 = vpop.f32.mrb[4].mxu0  ;;  %v1856_v24 = vand.u32 2147483647, %v3523_v31 }
 0x1a3   :  { %v3525_v39 = vadd.f32 %v1213_v36, %v741_v60  ;;  %v743_v41 = vpop.f32.mrb[5].mxu1  ;;  %v1215_v7 = vpop.f32.mrb[5].mxu0 }
 0x1a4   :  { %v3527_v49 = vadd.f32 %v1215_v7, %v743_v41 }
 0x1a5   :  { %v1234_v22 = vmax.f32 %v3517_v47, %v3525_v39  ;;  %v1252_v20 = vmin.f32 %v3517_v47, %v3525_v39  ;;  %v1857_v3 = vand.u32 2147483647, %v3525_v39 }
 0x1a6   :  { %v1243_v56 = vmax.f32 %v3519_v19, %v3527_v49  ;;  %v1261_v38 = vmin.f32 %v3519_v19, %v3527_v49  ;;  %v749_v42 = vpop.f32.mrb[6].mxu1  ;;  %v1220_v1 = vpop.f32.mrb[6].mxu0  ;;  %v1858_v23 = vand.u32 2147483647, %v3527_v49 }
 0x1a7   :  { %v3537_v52 = vadd.f32 %v1220_v1, %v749_v42  ;;  %v751_v5 = vpop.f32.mrb[7].mxu1  ;;  %v1222_v40 = vpop.f32.mrb[7].mxu0 }
 0x1a8   :  { %v3539_v37 = vadd.f32 %v1222_v40, %v751_v5 }
 0x1a9   :  { %v1235_v33 = vmax.f32 %v3521_v18, %v3537_v52  ;;  %v1253_v63 = vmin.f32 %v3521_v18, %v3537_v52  ;;  %v1859_v13 = vand.u32 2147483647, %v3537_v52 }
 0x1aa   :  { %v1244_v6 = vmax.f32 %v3523_v31, %v3539_v37  ;;  %v1262_v35 = vmin.f32 %v3523_v31, %v3539_v37  ;;  %v757_v11 = vpop.f32.mrb[8].mxu1  ;;  %v1227_v15 = vpop.f32.mrb[8].mxu0  ;;  %v3883_v57 = vand.u32 2147483647, %v3539_v37 }
 0x1ab   :  { %v1236_v12 = vmax.f32 %v1234_v22, %v1235_v33  ;;  %v1254_v26 = vmin.f32 %v1252_v20, %v1253_v63  ;;  %v2640_v44 = vadd.f32 %v1227_v15, %v757_v11  ;;  %v759_v55 = vpop.f32.mrb[9].mxu1  ;;  %v1229_v21 = vpop.f32.mrb[9].mxu0 }
 0x1ac   :  { %v1245_v30 = vmax.f32 %v1243_v56, %v1244_v6  ;;  %v1263_v32 = vmin.f32 %v1261_v38, %v1262_v35  ;;  %v2641_v54 = vadd.f32 %v1229_v21, %v759_v55 }
 0x1ad   :  { %v1237_v45 = vrot.slane %v1236_v12, 4  ;;  %v1255_v9 = vrot.slane %v1254_v26, 4  ;;  %v1232_v14 = vmul.f32 0.03125, %v2640_v44 }
 0x1ae   :  { %v1246_v27 = vrot.slane %v1245_v30, 4  ;;  %v1264_v25 = vrot.slane %v1263_v32, 4  ;;  %v1233_v43 = vmul.f32 0.03125, %v2641_v54 }
 0x1af   :  { %v1238_v2 = vmax.f32 %v1236_v12, %v1237_v45  ;;  %v1256_v50 = vmin.f32 %v1254_v26, %v1255_v9  ;;  %v3560_v34 = vrot.slane %v1232_v14, %v3546_v46 }
 0x1b0   :  { %v1247_v17 = vmax.f32 %v1245_v30, %v1246_v27  ;;  %v1265_v8 = vmin.f32 %v1263_v32, %v1264_v25  ;;  %v3564_v59 = vrot.slane %v1233_v43, %v3546_v46 }
 0x1b1   :  { %v1239_v29 = vrot.slane %v1238_v2, 2  ;;  %v1257_v53 = vrot.slane %v1256_v50, 2  ;;  %v1278_v61 = vsub.f32 %v3517_v47, %v3560_v34  ;;  %v1280_v60 = vsub.f32 %v3521_v18, %v3560_v34 }
 0x1b2   :  { %v1248_v36 = vrot.slane %v1247_v17, 2  ;;  %v1266_v41 = vrot.slane %v1265_v8, 2  ;;  %v1279_v7 = vsub.f32 %v3519_v19, %v3564_v59  ;;  %v1281_v22 = vsub.f32 %v3523_v31, %v3564_v59 }
 0x1b3   :  { %v1240_v20 = vmax.f32 %v1238_v2, %v1239_v29  ;;  %v1258_v56 = vmin.f32 %v1256_v50, %v1257_v53  ;;  %v1286_v38 = vmul.f32 %v1278_v61, %v1278_v61  ;;  %v1288_v42 = vmul.f32 %v1280_v60, %v1280_v60 }
 0x1b4   :  { %v1249_v1 = vmax.f32 %v1247_v17, %v1248_v36  ;;  %v1267_v5 = vmin.f32 %v1265_v8, %v1266_v41  ;;  %v1287_v40 = vmul.f32 %v1279_v7, %v1279_v7  ;;  %v1289_v33 = vmul.f32 %v1281_v22, %v1281_v22 }
 0x1b5   :  { %v1241_v63 = vrot.slane %v1240_v20, 1  ;;  %v1259_v6 = vrot.slane %v1258_v56, 1  ;;  %v1296_v35 = vand.u32 4294901760, %v1286_v38  ;;  %v1300_v11 = vand.u32 4294901760, %v1288_v42 }
 0x1b6   :  { %v1250_v15 = vrot.slane %v1249_v1, 1  ;;  %v1268_v12 = vrot.slane %v1267_v5, 1  ;;  %v1294_v26 = vand.u32 4294901760, %v1287_v40  ;;  %v1298_v44 = vand.u32 4294901760, %v1289_v33 }
 0x1b7   :  { %v3574_v55 = vmax.f32 %v1240_v20, %v1241_v63  ;;  %v3576_v21 = vmin.f32 %v1258_v56, %v1259_v6  ;;  %v3578_v30 = vpack.c.bf16 %v1300_v11, %v1296_v35  ;;  %v3580_v32 = vsub.f32 %v1286_v38, %v1296_v35  ;;  %v3960_v38 = vld [vmem:[#allocation22_spill] sm:$0xff] }
 0x1b8   :  { %v3582_v54 = vmax.f32 %v1249_v1, %v1250_v15  ;;  %v3584_v45 = vmin.f32 %v1267_v5, %v1268_v12  ;;  %v3586_v9 = vpack.c.bf16 %v1298_v44, %v1294_v26  ;;  %v3588_v14 = vsub.f32 %v1287_v40, %v1294_v26  ;;  %v3961_v1 = vld [vmem:[#allocation25_spill] sm:$0xff]  ;;  %v3962_v40 = vld [vmem:[#allocation26_spill] sm:$0xff] }
 0x1b9   :  { %v1861_v27 = vsub.f32 0.0, %v3576_v21  ;;  %v3591_v25 = vsub.f32 %v1289_v33, %v1298_v44  ;;  %v3593_v43 = vsub.f32 %v1288_v42, %v1300_v11  ;;  %v1283_v2 = vsub.f32 %v3527_v49, %v3564_v59 }
 0x1ba   :  { %v1862_v50 = vsub.f32 0.0, %v3584_v45  ;;  %2585 = vmatprep.subr.bf16.mxu0 %v3586_v9  ;;  %2609 = vmatprep.subr.bf16.mxu1 %v3586_v9  ;;  %v1285_v17 = vsub.f32 %v3539_v37, %v3564_v59  ;;  %v1282_v8 = vsub.f32 %v3525_v39, %v3560_v34  ;;  %v1284_v29 = vsub.f32 %v3537_v52, %v3560_v34 }
 0x1bb   :  { %v1863_v53 = vmax.f32 %v3574_v55, %v1861_v27  ;;  %2587 = vmatpush1.bf16.msra.mxu0 %v3578_v30  ;;  %2611 = vmatpush1.bf16.msra.mxu1 %v3578_v30  ;;  %v1291_v61 = vmul.f32 %v1283_v2, %v1283_v2  ;;  %v1380_v60 = vand.u32 4294901760, %v3588_v14  ;;  %v1392_v36 = vand.u32 4294901760, %v3591_v25 }
 0x1bc   :  { %v1864_v41 = vmax.f32 %v3582_v54, %v1862_v50  ;;  %v1293_v7 = vmul.f32 %v1285_v17, %v1285_v17  ;;  %v1290_v22 = vmul.f32 %v1282_v8, %v1282_v8  ;;  %v1292_v20 = vmul.f32 %v1284_v29, %v1284_v29 }
 0x1bd   :  { %vm1865_vm5 = vcmp.eq.f32.partialorder %v1853_v0, %v1863_v53  ;;  %vm1867_vm6 = vcmp.eq.f32.partialorder %v1855_v16, %v1863_v53  ;;  %vm1869_vm7 = vcmp.eq.f32.partialorder %v1857_v3, %v1863_v53  ;;  %vm1871_vm8 = vcmp.eq.f32.partialorder %v1859_v13, %v1863_v53 }
 0x1be   :  { %v1873_v56 = vsel %vm1865_vm5, %v3959_v58, 4294967295  ;;  %v1875_v42 = vsel %vm1867_vm6, %v3960_v38, 4294967295  ;;  %v1877_v5 = vsel %vm1869_vm7, %v3961_v1, 4294967295  ;;  %v1879_v33 = vsel %vm1871_vm8, %v3962_v40, 4294967295 }
 0x1bf   :  { %vm1881_vm9 = vcmp.gt.s32.totalorder %v1873_v56, %v1877_v5  ;;  %vm1883_vm10 = vcmp.gt.s32.totalorder %v1875_v42, %v1879_v33  ;;  %vm1866_vm11 = vcmp.eq.f32.partialorder %v1854_v4, %v1864_v41  ;;  %vm1868_vm12 = vcmp.eq.f32.partialorder %v1856_v24, %v1864_v41 }
 0x1c0   :  { %v1882_v63 = vsel %vm1881_vm9, %v1873_v56, %v1877_v5  ;;  %v1884_v6 = vsel %vm1883_vm10, %v1875_v42, %v1879_v33  ;;  %vm1870_vm13 = vcmp.eq.f32.partialorder %v1858_v23, %v1864_v41  ;;  %vm1872_vm14 = vcmp.eq.f32.partialorder %v3883_v57, %v1864_v41 }
 0x1c1   :  { %vm1885_vm15 = vcmp.gt.s32.totalorder %v1882_v63, %v1884_v6  ;;  %v1874_v35 = vsel %vm1866_vm11, %v3959_v58, 4294967295  ;;  %v1876_v11 = vsel %vm1868_vm12, %v3960_v38, 4294967295  ;;  %v1878_v15 = vsel %vm1870_vm13, %v3961_v1, 4294967295 }
 0x1c2   :  { %v1886_v12 = vsel %vm1885_vm15, %v1882_v63, %v1884_v6  ;;  %v1880_v26 = vsel %vm1872_vm14, %v3962_v40, 4294967295  ;;  %vm1896_vm1 = vcmp.gt.s32.totalorder %v1874_v35, %v1878_v15  ;;  %v1302_v44 = vand.u32 4294901760, %v1291_v61 }
 0x1c3   :  { %v1887_v27 = vrot.slane %v1886_v12, 4  ;;  %v1897_v2 = vsel %vm1896_vm1, %v1874_v35, %v1878_v15  ;;  %vm1898_vm2 = vcmp.gt.s32.totalorder %v1876_v11, %v1880_v26  ;;  %v1306_v50 = vand.u32 4294901760, %v1293_v7 }
 0x1c4   :  { %v1899_v17 = vsel %vm1898_vm2, %v1876_v11, %v1880_v26  ;;  %v3636_v8 = vsub.f32 %v1291_v61, %v1302_v44  ;;  %v1304_v29 = vand.u32 4294901760, %v1290_v22  ;;  %v1308_v53 = vand.u32 4294901760, %v1292_v20 }
 0x1c5   :  { %vm1888_vm3 = vcmp.gt.s32.totalorder %v1886_v12, %v1887_v27  ;;  %vm1900_vm4 = vcmp.gt.s32.totalorder %v1897_v2, %v1899_v17  ;;  %v3638_v41 = vpack.c.bf16 %v1306_v50, %v1302_v44  ;;  %v3640_v56 = vsub.f32 %v1293_v7, %v1306_v50 }
 0x1c6   :  { %v1889_v42 = vsel %vm1888_vm3, %v1886_v12, %v1887_v27  ;;  %v1901_v5 = vsel %vm1900_vm4, %v1897_v2, %v1899_v17  ;;  %v3642_v33 = vpack.c.bf16 %v1308_v53, %v1304_v29  ;;  %v3644_v63 = vsub.f32 %v1290_v22, %v1304_v29 }
 0x1c7   :  { %v1890_v6 = vrot.slane %v1889_v42, 2  ;;  %v1902_v35 = vrot.slane %v1901_v5, 4  ;;  %2589 = vmatprep.subr.bf16.mxu0 %v3638_v41  ;;  %2613 = vmatprep.subr.bf16.mxu1 %v3638_v41  ;;  %v3648_v61 = vsub.f32 %v1292_v20, %v1308_v53  ;;  %v2616_v11 = vpack.c.bf16 %v1392_v36, %v1380_v60 }
 0x1c8   :  { %2591 = vmatpush1.bf16.msra.mxu0 %v3642_v33  ;;  %2615 = vmatpush1.bf16.msra.mxu1 %v3642_v33  ;;  %v1381_v7 = vsub.f32 %v3588_v14, %v1380_v60  ;;  %v1393_v15 = vsub.f32 %v3591_v25, %v1392_v36  ;;  %v1386_v22 = vand.u32 4294901760, %v3580_v32  ;;  %v1398_v12 = vand.u32 4294901760, %v3593_v43 }
 0x1c9   :  { %vm1891_vm5 = vcmp.gt.s32.totalorder %v1889_v42, %v1890_v6  ;;  %vm1903_vm6 = vcmp.gt.s32.totalorder %v1901_v5, %v1902_v35  ;;  %2617 = vmatprep.subr.bf16.mxu1 %v2616_v11  ;;  %v1404_v26 = vand.u32 4294901760, %v3636_v8  ;;  %v1416_v20 = vand.u32 4294901760, %v3640_v56 }
 0x1ca   :  { %v1892_v44 = vsel %vm1891_vm5, %v1889_v42, %v1890_v6  ;;  %v1904_v27 = vsel %vm1903_vm6, %v1901_v5, %v1902_v35  ;;  %v1382_v2 = vand.u32 4294901760, %v1381_v7  ;;  %v1394_v50 = vand.u32 4294901760, %v1393_v15 }
 0x1cb   :  { %v1893_v17 = vrot.slane %v1892_v44, 1  ;;  %v1905_v29 = vrot.slane %v1904_v27, 2  ;;  %1372 = vmatmul.mubr.f32.vlgmr.msra.gmra.mrb[10].mxu0 %v3333_v48  ;;  %1655 = vmatmul.mubr.f32.vlgmr.msra.gmra.mrb[10].mxu1 %v3292_v28  ;;  %v1387_v60 = vsub.f32 %v3580_v32, %v1386_v22  ;;  %v1399_v36 = vsub.f32 %v3593_v43, %v1398_v12 }
 0x1cc   :  { %v2592_v53 = vpack.c.bf16 %v1394_v50, %v1382_v2  ;;  %v2618_v11 = vpack.c.bf16 %v1398_v12, %v1386_v22  ;;  %v1405_v10 = vsub.f32 %v3636_v8, %v1404_v26  ;;  %v1417_v57 = vsub.f32 %v3640_v56, %v1416_v20  ;;  %1482 = vmatprep.mubr.f32.mxu0 %v3958_v51 }
 0x1cd   :  { %vm1894_vm7 = vcmp.gt.s32.totalorder %v1892_v44, %v1893_v17  ;;  %vm1906_vm8 = vcmp.gt.s32.totalorder %v1904_v27, %v1905_v29  ;;  %v1388_v42 = vand.u32 4294901760, %v1387_v60  ;;  %v1400_v5 = vand.u32 4294901760, %v1399_v36  ;;  %1749 = vmatprep.mubr.f32.mxu1 %v3958_v51 }
 0x1ce   :  { %v3666_v48 = vsel %vm1894_vm7, %v1892_v44, %v1893_v17  ;;  %v1907_v28 = vsel %vm1906_vm8, %v1904_v27, %v1905_v29  ;;  %2593 = vmatprep.subr.bf16.mxu0 %v2592_v53  ;;  %2619 = vmatpush1.bf16.msra.mxu1 %v2618_v11  ;;  %v1406_v6 = vand.u32 4294901760, %v1405_v10  ;;  %v1418_v35 = vand.u32 4294901760, %v1417_v57 }
 0x1cf   :  { %vm1911_vm9 = vcmp.eq.s32.totalorder %v3959_v58, %v3666_v48  ;;  %vm1913_vm10 = vcmp.eq.s32.totalorder %v3960_v38, %v3666_v48  ;;  %vm1915_vm11 = vcmp.eq.s32.totalorder %v3961_v1, %v3666_v48  ;;  %vm1917_vm12 = vcmp.eq.s32.totalorder %v3962_v40, %v3666_v48 }
 0x1d0   :  { %v3678_v7 = vsel %vm1911_vm9, -inf, %v1853_v0  ;;  %v3682_v10 = vsel %vm1913_vm10, -inf, %v1855_v16  ;;  %v3686_v57 = vsel %vm1915_vm11, -inf, %v1857_v3  ;;  %v3690_v15 = vsel %vm1917_vm12, -inf, %v1859_v13 }
 0x1d1   :  { %v1927_v22 = vmax.f32 %v3678_v7, %v3686_v57  ;;  %v1928_v47 = vmax.f32 %v3682_v10, %v3690_v15  ;;  %v1908_v0 = vrot.slane %v1907_v28, 1  ;;  %v2594_v12 = vpack.c.bf16 %v1400_v5, %v1388_v42 }
 0x1d2   :  { %v2596_v44 = vpack.c.bf16 %v1418_v35, %v1406_v6  ;;  %v2620_v18 = vpack.c.bf16 %v1416_v20, %v1404_v26  ;;  %v1410_v16 = vand.u32 4294901760, %v3644_v63  ;;  %v1422_v39 = vand.u32 4294901760, %v3648_v61 }
 0x1d3   :  { %v1929_v3 = vmax.f32 %v1927_v22, %v1928_v47  ;;  %vm1909_vm13 = vcmp.gt.s32.totalorder %v1907_v28, %v1908_v0  ;;  %2595 = vmatpush1.bf16.msra.mxu0 %v2594_v12  ;;  %v2600_v52 = vpack.c.bf16 %v3591_v25, %v3588_v14  ;;  %v2602_v13 = vpack.c.bf16 %v3593_v43, %v3580_v32 }
 0x1d4   :  { %v3702_v27 = vsel %vm1909_vm13, %v1907_v28, %v1908_v0  ;;  %2597 = vmatprep.subr.bf16.mxu0 %v2596_v44  ;;  %2621 = vmatprep.subr.bf16.mxu1 %v2620_v18  ;;  %v1411_v2 = vsub.f32 %v3644_v63, %v1410_v16  ;;  %v1423_v26 = vsub.f32 %v3648_v61, %v1422_v39  ;;  %v3963_v50 = vand.u32 2147483647, %v3539_v37 }
 0x1d5   :  { %v1930_v20 = vrot.slane %v1929_v3, 4  ;;  %vm1912_vm14 = vcmp.eq.s32.totalorder %v3959_v58, %v3702_v27  ;;  %vm1914_vm15 = vcmp.eq.s32.totalorder %v3960_v38, %v3702_v27  ;;  %vm1916_vm1 = vcmp.eq.s32.totalorder %v3961_v1, %v3702_v27 }
 0x1d6   :  { %vm1918_vm2 = vcmp.eq.s32.totalorder %v3962_v40, %v3702_v27  ;;  %v3716_v32 = vsel %vm1912_vm14, -inf, %v1854_v4  ;;  %v3720_v14 = vsel %vm1914_vm15, -inf, %v1856_v24  ;;  %v3724_v25 = vsel %vm1916_vm1, -inf, %v1858_v23 }
 0x1d7   :  { %v1931_v43 = vmax.f32 %v1929_v3, %v1930_v20  ;;  %v3728_v17 = vsel %vm1918_vm2, -inf, %v3963_v50  ;;  %v1936_v29 = vmax.f32 %v3716_v32, %v3724_v25  ;;  %v1412_v60 = vand.u32 4294901760, %v1411_v2 }
 0x1d8   :  { %v1937_v19 = vmax.f32 %v3720_v14, %v3728_v17  ;;  %v1424_v4 = vand.u32 4294901760, %v1423_v26  ;;  %v2622_v31 = vpack.c.bf16 %v1422_v39, %v1410_v16  ;;  %v2604_v24 = vpack.c.bf16 %v3640_v56, %v3636_v8 }
 0x1d9   :  { %v1932_v49 = vrot.slane %v1931_v43, 2  ;;  %v2606_v23 = vpack.c.bf16 %v3648_v61, %v3644_v63  ;;  %v3964_v5 = vmov 1.0  }
 0x1da   :  { %v1938_v36 = vmax.f32 %v1936_v29, %v1937_v19  ;;  %v2598_v37 = vpack.c.bf16 %v1424_v4, %v1412_v60  ;;  %2623 = vmatpush1.bf16.msra.mxu1 %v2622_v31 }
 0x1db   :  { %v1933_v53 = vmax.f32 %v1931_v43, %v1932_v49  ;;  %2625 = vmatprep.subr.bf16.mxu1 %v3586_v9  ;;  %v2082_v43 = vcvt.s32.f32 %v3666_v48 }
 0x1dc   :  { %v1939_v11 = vrot.slane %v1938_v36, 4  ;;  %2599 = vmatpush1.bf16.msra.mxu0 %v2598_v37 }
 0x1dd   :  { %v1934_v42 = vrot.slane %v1933_v53, 1  ;;  %2601 = vmatprep.subr.bf16.mxu0 %v2600_v52  ;;  %2138 = vmatmul.mubr.msk.f32.vlgmr.msra.gmra.mrb[10].mxu1 %vm69_vm0, %v3964_v5 }
 0x1de   :  { %v1940_v28 = vmax.f32 %v1938_v36, %v1939_v11  ;;  %2627 = vmatpush1.bf16.msra.mxu1 %v3578_v30  ;;  %1829 = vmatprep.mubr.f32.mxu1 %v3958_v51 }
 0x1df   :  { %v1935_v8 = vmax.f32 %v1933_v53, %v1934_v42  ;;  %2137 = vmatmul.mubr.msk.f32.vlgmr.msra.gmra.mrb[10].mxu0 %vm69_vm0, %v3964_v5  ;;  %2629 = vmatprep.subr.bf16.mxu1 %v3638_v41  ;;  %v2083_v42 = vcvt.s32.f32 %v3702_v27 }
 0x1e0   :  { %v1941_v56 = vrot.slane %v1940_v28, 2  ;;  %2603 = vmatpush1.bf16.msra.mxu0 %v2602_v13  ;;  %1570 = vmatprep.mubr.f32.mxu0 %v3958_v51 }
 0x1e1   :  { %vm1945_vm3 = vcmp.eq.f32.partialorder %v3678_v7, %v1935_v8  ;;  %vm1947_vm4 = vcmp.eq.f32.partialorder %v3682_v10, %v1935_v8  ;;  %vm1949_vm5 = vcmp.eq.f32.partialorder %v3686_v57, %v1935_v8  ;;  %vm1951_vm6 = vcmp.eq.f32.partialorder %v3690_v15, %v1935_v8  ;;  %2605 = vmatprep.subr.bf16.mxu0 %v2604_v24 }
 0x1e2   :  { %v1953_v30 = vsel %vm1945_vm3, %v3959_v58, 4294967295  ;;  %v1955_v9 = vsel %vm1947_vm4, %v3960_v38, 4294967295  ;;  %v1957_v63 = vsel %vm1949_vm5, %v3961_v1, 4294967295  ;;  %v1959_v41 = vsel %vm1951_vm6, %v3962_v40, 4294967295  ;;  %2631 = vmatpush1.bf16.msra.mxu1 %v3642_v33 }
 0x1e3   :  { %vm1961_vm7 = vcmp.gt.s32.totalorder %v1953_v30, %v1957_v63  ;;  %vm1963_vm8 = vcmp.gt.s32.totalorder %v1955_v9, %v1959_v41  ;;  %v1942_v51 = vmax.f32 %v1940_v28, %v1941_v56  ;;  %vm2081_vm4 = vcmp.eq.s32.totalorder %v3959_v58, 6 }
 0x1e4   :  { %v1962_v61 = vsel %vm1961_vm7, %v1953_v30, %v1957_v63  ;;  %v1964_v6 = vsel %vm1963_vm8, %v1955_v9, %v1959_v41  ;;  %2607 = vmatpush1.bf16.msra.mxu0 %v2606_v23  ;;  %vm2078_vm6 = vcmp.eq.s32.totalorder %v3959_v58, 5  ;;  %v2084_v23 = vsel %vm2081_vm4, %v2082_v43, 0.0 }
 0x1e5   :  { %vm1965_vm9 = vcmp.gt.s32.totalorder %v1962_v61, %v1964_v6  ;;  %v1943_v35 = vrot.slane %v1942_v51, 1  ;;  %2139 = vmatmul.mubr.msk.f32.vlgmr.msra.gmra.mrb[10].mxu1 %vm69_vm0, %v3964_v5 }
 0x1e6   :  { %v1966_v22 = vsel %vm1965_vm9, %v1962_v61, %v1964_v6 }
 0x1e7   :  { %v1967_v47 = vrot.slane %v1966_v22, 4  ;;  %v1944_v0 = vmax.f32 %v1942_v51, %v1943_v35  ;;  %1573 = vmatmul.mubr.f32.vlgmr.msra.gmra.mrb[10].mxu0 %v3271_v62  ;;  %v2085_v51 = vsel %vm2081_vm4, %v2083_v42, 0.0 }
 0x1e9   :  { %vm1968_vm10 = vcmp.gt.s32.totalorder %v1966_v22, %v1967_v47  ;;  %vm1946_vm11 = vcmp.eq.f32.partialorder %v3716_v32, %v1944_v0  ;;  %vm1948_vm12 = vcmp.eq.f32.partialorder %v3720_v14, %v1944_v0  ;;  %vm1950_vm13 = vcmp.eq.f32.partialorder %v3724_v25, %v1944_v0 }
 0x1ea   :  { %v1969_v33 = vsel %vm1968_vm10, %v1966_v22, %v1967_v47  ;;  %vm1952_vm14 = vcmp.eq.f32.partialorder %v3728_v17, %v1944_v0  ;;  %v1954_v12 = vsel %vm1946_vm11, %v3959_v58, 4294967295  ;;  %v1956_v44 = vsel %vm1948_vm12, %v3960_v38, 4294967295 }
 0x1eb   :  { %v1970_v18 = vrot.slane %v1969_v33, 2  ;;  %v1958_v16 = vsel %vm1950_vm13, %v3961_v1, 4294967295  ;;  %v1960_v39 = vsel %vm1952_vm14, %v3962_v40, 4294967295 }
 0x1ec   :  { %vm1976_vm0 = vcmp.gt.s32.totalorder %v1954_v12, %v1958_v16  ;;  %vm1978_vm15 = vcmp.gt.s32.totalorder %v1956_v44, %v1960_v39 }
 0x1ed   :  { %vm1971_vm1 = vcmp.gt.s32.totalorder %v1969_v33, %v1970_v18  ;;  %v1977_v62 = vsel %vm1976_vm0, %v1954_v12, %v1958_v16  ;;  %v1979_v3 = vsel %vm1978_vm15, %v1956_v44, %v1960_v39 }
 0x1ee   :  { %v1972_v52 = vsel %vm1971_vm1, %v1969_v33, %v1970_v18  ;;  %vm1980_vm2 = vcmp.gt.s32.totalorder %v1977_v62, %v1979_v3 }
 0x1ef   :  { %v1973_v13 = vrot.slane %v1972_v52, 1  ;;  %v1981_v2 = vsel %vm1980_vm2, %v1977_v62, %v1979_v3 }
 0x1f0   :  { %v1982_v26 = vrot.slane %v1981_v2, 4 }
 0x1f1   :  { %vm1974_vm3 = vcmp.gt.s32.totalorder %v1972_v52, %v1973_v13 }
 0x1f2   :  { %v1975_v20 = vsel %vm1974_vm3, %v1972_v52, %v1973_v13  ;;  %vm1983_vm5 = vcmp.gt.s32.totalorder %v1981_v2, %v1982_v26 }
 0x1f3   :  { %vm1991_vm7 = vcmp.eq.s32.totalorder %v3959_v58, %v1975_v20  ;;  %vm1993_vm8 = vcmp.eq.s32.totalorder %v3960_v38, %v1975_v20  ;;  %vm1995_vm9 = vcmp.eq.s32.totalorder %v3961_v1, %v1975_v20  ;;  %vm1997_vm10 = vcmp.eq.s32.totalorder %v3962_v40, %v1975_v20 }
 0x1f4   :  { %v1999_v50 = vsel %vm1991_vm7, -inf, %v3678_v7  ;;  %v2001_v29 = vsel %vm1993_vm8, -inf, %v3682_v10  ;;  %v2003_v60 = vsel %vm1995_vm9, -inf, %v3686_v57  ;;  %v2005_v19 = vsel %vm1997_vm10, -inf, %v3690_v15 }
 0x1f5   :  { %v2007_v4 = vmax.f32 %v1999_v50, %v2003_v60  ;;  %v2008_v31 = vmax.f32 %v2001_v29, %v2005_v19  ;;  %v1984_v24 = vsel %vm1983_vm5, %v1981_v2, %v1982_v26  ;;  %v2079_v48 = vcvt.s32.f32 %v1975_v20 }
 0x1f6   :  { %v1985_v49 = vrot.slane %v1984_v24, 2 }
 0x1f7   :  { %v2009_v36 = vmax.f32 %v2007_v4, %v2008_v31  ;;  %v3782_v37 = vsel %vm2078_vm6, %v2079_v48, %v2084_v23 }
 0x1f8   :  { %vm1986_vm11 = vcmp.gt.s32.totalorder %v1984_v24, %v1985_v49 }
 0x1f9   :  { %v2010_v7 = vrot.slane %v2009_v36, 4  ;;  %v1987_v10 = vsel %vm1986_vm11, %v1984_v24, %v1985_v49 }
 0x1fa   :  { %v1988_v53 = vrot.slane %v1987_v10, 1 }
 0x1fb   :  { %v2011_v57 = vmax.f32 %v2009_v36, %v2010_v7 }
 0x1fc   :  { %vm1989_vm12 = vcmp.gt.s32.totalorder %v1987_v10, %v1988_v53 }
 0x1fd   :  { %v2012_v15 = vrot.slane %v2011_v57, 2  ;;  %v1990_v11 = vsel %vm1989_vm12, %v1987_v10, %v1988_v53 }
 0x1fe   :  { %vm1992_vm13 = vcmp.eq.s32.totalorder %v3959_v58, %v1990_v11  ;;  %vm1994_vm14 = vcmp.eq.s32.totalorder %v3960_v38, %v1990_v11  ;;  %vm1996_vm0 = vcmp.eq.s32.totalorder %v3961_v1, %v1990_v11  ;;  %vm1998_vm15 = vcmp.eq.s32.totalorder %v3962_v40, %v1990_v11 }
 0x1ff   :  { %v2013_v5 = vmax.f32 %v2011_v57, %v2012_v15  ;;  %v2000_v28 = vsel %vm1992_vm13, -inf, %v3716_v32  ;;  %v2002_v8 = vsel %vm1994_vm14, -inf, %v3720_v14  ;;  %v2004_v56 = vsel %vm1996_vm0, -inf, %v3724_v25 }
 0x200   :  { %v2006_v30 = vsel %vm1998_vm15, -inf, %v3728_v17  ;;  %v2016_v9 = vmax.f32 %v2000_v28, %v2004_v56  ;;  %v2080_v63 = vcvt.s32.f32 %v1990_v11 }
 0x201   :  { %v2014_v27 = vrot.slane %v2013_v5, 1  ;;  %v2017_v41 = vmax.f32 %v2002_v8, %v2006_v30 }
 0x202   :  { %v2087_v61 = vsel %vm2078_vm6, %v2080_v63, %v2085_v51 }
 0x203   :  { %v2015_v6 = vmax.f32 %v2013_v5, %v2014_v27  ;;  %v2018_v35 = vmax.f32 %v2016_v9, %v2017_v41 }
 0x205   :  { %vm2025_vm1 = vcmp.eq.f32.partialorder %v1999_v50, %v2015_v6  ;;  %vm2027_vm2 = vcmp.eq.f32.partialorder %v2001_v29, %v2015_v6  ;;  %vm2029_vm3 = vcmp.eq.f32.partialorder %v2003_v60, %v2015_v6  ;;  %vm2031_vm5 = vcmp.eq.f32.partialorder %v2005_v19, %v2015_v6 }
 0x206   :  { %v2033_v32 = vsel %vm2025_vm1, %v3959_v58, 4294967295  ;;  %v2035_v14 = vsel %vm2027_vm2, %v3960_v38, 4294967295  ;;  %v2037_v25 = vsel %vm2029_vm3, %v3961_v1, 4294967295  ;;  %v2039_v17 = vsel %vm2031_vm5, %v3962_v40, 4294967295 }
 0x207   :  { %vm2041_vm7 = vcmp.gt.s32.totalorder %v2033_v32, %v2037_v25  ;;  %vm2043_vm8 = vcmp.gt.s32.totalorder %v2035_v14, %v2039_v17  ;;  %v2019_v22 = vrot.slane %v2018_v35, 4  ;;  %vm2075_vm2 = vcmp.eq.s32.totalorder %v3959_v58, 4 }
 0x208   :  { %v2042_v47 = vsel %vm2041_vm7, %v2033_v32, %v2037_v25  ;;  %v2044_v0 = vsel %vm2043_vm8, %v2035_v14, %v2039_v17  ;;  %vm2074_vm8 = vcmp.eq.s32.totalorder %v3959_v58, 3 }
 0x209   :  { %vm2045_vm4 = vcmp.gt.s32.totalorder %v2042_v47, %v2044_v0  ;;  %v2020_v33 = vmax.f32 %v2018_v35, %v2019_v22 }
 0x20a   :  { %v2046_v12 = vsel %vm2045_vm4, %v2042_v47, %v2044_v0  ;;  %vm2073_vm4 = vcmp.eq.s32.totalorder %v3959_v58, 2 }
 0x20b   :  { %v2047_v44 = vrot.slane %v2046_v12, 4  ;;  %v2021_v18 = vrot.slane %v2020_v33, 2 }
 0x20d   :  { %vm2048_vm6 = vcmp.gt.s32.totalorder %v2046_v12, %v2047_v44  ;;  %v2022_v16 = vmax.f32 %v2020_v33, %v2021_v18 }
 0x20e   :  { %v2049_v39 = vsel %vm2048_vm6, %v2046_v12, %v2047_v44 }
 0x20f   :  { %v2050_v62 = vrot.slane %v2049_v39, 2  ;;  %v2023_v3 = vrot.slane %v2022_v16, 1 }
 0x211   :  { %v2024_v52 = vmax.f32 %v2022_v16, %v2023_v3  ;;  %vm2051_vm9 = vcmp.gt.s32.totalorder %v2049_v39, %v2050_v62 }
 0x212   :  { %v2052_v13 = vsel %vm2051_vm9, %v2049_v39, %v2050_v62 }
 0x213   :  { %vm2026_vm10 = vcmp.eq.f32.partialorder %v2000_v28, %v2024_v52  ;;  %vm2028_vm11 = vcmp.eq.f32.partialorder %v2002_v8, %v2024_v52  ;;  %vm2030_vm12 = vcmp.eq.f32.partialorder %v2004_v56, %v2024_v52  ;;  %vm2032_vm13 = vcmp.eq.f32.partialorder %v2006_v30, %v2024_v52 }
 0x214   :  { %v2034_v2 = vsel %vm2026_vm10, %v3959_v58, 4294967295  ;;  %v2036_v26 = vsel %vm2028_vm11, %v3960_v38, 4294967295  ;;  %v2038_v20 = vsel %vm2030_vm12, %v3961_v1, 4294967295  ;;  %v2040_v43 = vsel %vm2032_vm13, %v3962_v40, 4294967295 }
 0x215   :  { %vm2056_vm14 = vcmp.gt.s32.totalorder %v2034_v2, %v2038_v20  ;;  %vm2058_vm0 = vcmp.gt.s32.totalorder %v2036_v26, %v2040_v43  ;;  %v2053_v50 = vrot.slane %v2052_v13, 1  ;;  %vm2072_vm12 = vcmp.eq.s32.totalorder %v3959_v58, 1 }
 0x216   :  { %v2057_v29 = vsel %vm2056_vm14, %v2034_v2, %v2038_v20  ;;  %v2059_v60 = vsel %vm2058_vm0, %v2036_v26, %v2040_v43  ;;  %vm2071_vm13 = vcmp.eq.s32.totalorder %v3959_v58, 0 }
 0x217   :  { %vm2060_vm15 = vcmp.gt.s32.totalorder %v2057_v29, %v2059_v60  ;;  %vm2054_vm1 = vcmp.gt.s32.totalorder %v2052_v13, %v2053_v50 }
 0x218   :  { %v2061_v19 = vsel %vm2060_vm15, %v2057_v29, %v2059_v60  ;;  %v2055_v4 = vsel %vm2054_vm1, %v2052_v13, %v2053_v50 }
 0x219   :  { %v2062_v31 = vrot.slane %v2061_v19, 4  ;;  %v2076_v24 = vcvt.s32.f32 %v2055_v4 }
 0x21b   :  { %vm2063_vm3 = vcmp.gt.s32.totalorder %v2061_v19, %v2062_v31  ;;  %v2088_v38 = vsel %vm2075_vm2, %v2076_v24, %v3782_v37 }
 0x21c   :  { %v2064_v48 = vsel %vm2063_vm3, %v2061_v19, %v2062_v31  ;;  %v2090_v30 = vsel %vm2074_vm8, %v3576_v21, %v2088_v38 }
 0x21d   :  { %v2065_v1 = vrot.slane %v2064_v48, 2  ;;  %v2092_v21 = vsel %vm2073_vm4, %v3574_v55, %v2090_v30 }
 0x21f   :  { %vm2066_vm5 = vcmp.gt.s32.totalorder %v2064_v48, %v2065_v1 }
 0x220   :  { %v2067_v40 = vsel %vm2066_vm5, %v2064_v48, %v2065_v1 }
 0x221   :  { %v2068_v49 = vrot.slane %v2067_v40, 1 }
 0x223   :  { %vm2069_vm7 = vcmp.gt.s32.totalorder %v2067_v40, %v2068_v49 }
 0x224   :  { %v2070_v23 = vsel %vm2069_vm7, %v2067_v40, %v2068_v49 }
 0x225   :  { %v2077_v36 = vcvt.s32.f32 %v2070_v23 }
 0x227   :  { %v2089_v7 = vsel %vm2075_vm2, %v2077_v36, %v2087_v61 }
 0x228   :  { %v2091_v27 = vsel %vm2074_vm8, %v3584_v45, %v2089_v7 }
 0x229   :  { %v2093_v14 = vsel %vm2073_vm4, %v3582_v54, %v2091_v27 }
 0x2b8   :  { %v1832_v10 = vpop.f32.mrb[10].mxu1 }
 0x2b9   :  { %v1834_v53 = vpop.f32.mrb[11].mxu1 }
 0x2ba   :  { %v1574_v57 = vpop.f32.mrb[10].mxu0 }
 0x2bb   :  { %v2642_v15 = vadd.f32 %v1832_v10, %v1574_v57  ;;  %v1576_v11 = vpop.f32.mrb[11].mxu0 }
 0x2bc   :  { %v2643_v42 = vadd.f32 %v1834_v53, %v1576_v11 }
 0x2bd   :  { %v1837_v5 = vmul.f32 0.03125, %v2642_v15 }
 0x2be   :  { %v1838_v28 = vmul.f32 0.03125, %v2643_v42 }
 0x2bf   :  { %2696 = vrsqrt.f32 %v1837_v5  ;;  %vm1841_vm6 = vcmp.eq.f32.partialorder %v1837_v5, inf  ;;  %v1844_v9 = vand.u32 2147483648, %v1837_v5  ;;  %vm1843_vm9 = vcmp.eq.f32.partialorder %v1837_v5, 0.0 }
 0x2c0   :  { %2698 = vrsqrt.f32 %v1838_v28  ;;  %vm1848_vm10 = vcmp.eq.f32.partialorder %v1838_v28, inf  ;;  %v1851_v51 = vand.u32 2147483648, %v1838_v28  ;;  %vm1850_vm11 = vcmp.eq.f32.partialorder %v1838_v28, 0.0 }
 0x2c9   :  { %v2697_v37 = vpop.eup %2696 }
 0x2ca   :  { %v2699_v8 = vpop.eup %2698  ;;  %v1840_v56 = vmul.f32 %v2697_v37, %v1837_v5 }
 0x2cb   :  { %v1847_v63 = vmul.f32 %v2699_v8, %v1838_v28 }
 0x2cc   :  { %v1842_v41 = vsel %vm1841_vm6, %v1837_v5, %v1840_v56 }
 0x2cd   :  { %v1845_v61 = vsel %vm1843_vm9, %v1844_v9, %v1842_v41  ;;  %v1849_v6 = vsel %vm1848_vm10, %v1838_v28, %v1847_v63 }
 0x2ce   :  { %v1852_v35 = vsel %vm1850_vm11, %v1851_v51, %v1849_v6  ;;  %v2097_v32 = vrot.slane %v1845_v61, %v3546_v46 }
 0x2cf   :  { %v2101_v45 = vrot.slane %v1852_v35, %v3546_v46 }
 0x2d0   :  { %v2102_v25 = vsel %vm2072_vm12, %v2097_v32, %v2092_v21 }
 0x2d1   :  { %v2103_v17 = vsel %vm2072_vm12, %v2101_v45, %v2093_v14  ;;  %v2104_v22 = vsel %vm2071_vm13, %v3560_v34, %v2102_v25 }
 0x2d2   :  { %v2105_v47 = vsel %vm2071_vm13, %v3564_v59, %v2103_v17  ;;  %2106 = vst [vmem:[#allocation2] sm:$0xff] %v2104_v22 }
 0x2d3   :  { %2107 = vst [vmem:[#allocation2 + $0x8] sm:$0xff] %v2105_v47 }
 0x2d4   :  { %2711 = shalt.err (!%p2708_p4)
}
 0x2d5   :  { %s2712_s16 = scalar_lea.hbm %s3836_s1, 256 }
 0x2d6   :  { %p2713_p5 = scmp.ne.s32.totalorder %s3836_s1, %s2712_s16  ;;  %p2716_p6 = scmp.lt.u32.totalorder %s2712_s16, %s3836_s1 }
 0x2d8   :  { %p2718_p7 = pnand %p2716_p6, %p2713_p5 }
 0x2da   :  { %2721 = shalt.err (!%p2718_p7)
}
 0x2db   :  { %2117 = dma.vmem_to_hbm [thread:$0]  %s2115_s12, 256, %s3836_s1, [#allocation3]  }
 0x2dc   :  { %2722 = dma.done.wait [#allocation3], 256  }
 0x2dd   :  { %2723 = vsyncadd [#allocation3], 4294967040 }
 0x2de   :  { %2121 = vsyncpa [#allocation3], 1 }

</bundles_post_ra>
